<compile_context>
chip_gen: v6e
topology: v6e:2x2x1
jax: 0.10.0
libtpu: 0.0.40
codegen_flags: <defaults>
</compile_context>

<pallas_src>
import jax
import jax.numpy as jnp
from jax import lax
from jax.experimental import pallas as pl
from jax.experimental.pallas import tpu as pltpu

EPS = 1.1920929e-07  # torch.finfo(torch.float32).eps, as used by cLN in espnet


# ----------------------------------------------------------------------------
# Pallas kernel
# ----------------------------------------------------------------------------
def mem_lstm_kernel(xh_ref, xc_ref,
                    wih_h_ref, whh_h_ref, b_h_ref, wp_h_ref, bp_h_ref,
                    gam_h_ref, bet_h_ref,
                    wih_c_ref, whh_c_ref, b_c_ref, wp_c_ref, bp_c_ref,
                    gam_c_ref, bet_c_ref,
                    oh_ref, oc_ref,
                    gxh_scr, gxc_scr, hsh_scr, hsc_scr):
    """Both MemLSTM branches for one batch tile.

    xh_ref / xc_ref / oh_ref / oc_ref : (TB, S, H)   batch-major tile
    wih/whh : (H, 4H) transposed LSTM weights, gate order [i, f, o, g]
              (pre-permuted + pre-cast to the matmul dtype on the host)
    b       : (1, 4H) = bias_ih + bias_hh, same gate order, f32
    wp      : (H, H) transposed projection (matmul dtype),  bp : (1, H) f32
    gam/bet : (1, H) cLN affine params, f32
    gx*_scr : (S-1, TB, 4H) VMEM scratch, hoisted input-projection gates
    hs*_scr : (S-1, TB, H)  VMEM scratch, per-step hidden states
    """
    TB, S, H = xh_ref.shape
    Sm1 = S - 1
    mm_dtype = wih_h_ref.dtype          # matmul operand dtype (f32 or bf16)
    sc_dtype = gxh_scr.dtype            # staging scratch dtype (f32 or bf16)

    xh = xh_ref[...].astype(jnp.float32)
    xc = xc_ref[...].astype(jnp.float32)

    # Time-major staging of the first S-1 steps: leading-axis dynamic indexing
    # inside the recurrence; the (Sm1*TB, H) reshapes are relayout-free when TB
    # is a multiple of 8 (production tiles).
    xh_t = jnp.transpose(xh[:, :Sm1, :], (1, 0, 2))        # (Sm1, TB, H)
    xc_t = jnp.transpose(xc[:, :Sm1, :], (1, 0, 2))

    # ---- (1) hoisted input projections: one bulk MXU matmul per branch ------
    def bulk_gates(x_t, wih_ref, b_ref, scr):
        g = jnp.dot(x_t.reshape(Sm1 * TB, H).astype(mm_dtype), wih_ref[...],
                    preferred_element_type=jnp.float32)
        scr[...] = (g + b_ref[...]).reshape(Sm1, TB, 4 * H).astype(sc_dtype)

    bulk_gates(xh_t, wih_h_ref, b_h_ref, gxh_scr)
    bulk_gates(xc_t, wih_c_ref, b_c_ref, gxc_scr)

    whh_h = whh_h_ref[...]
    whh_c = whh_c_ref[...]

    # ---- (2) interleaved recurrence for the two independent branches --------
    # Gate order is [i, f, o, g]: one 3H-wide sigmoid + one H-wide tanh / step.
    def step(t, carry):
        h_h, c_h, h_c, c_c = carry
        gh = gxh_scr[t].astype(jnp.float32) + jnp.dot(
            h_h.astype(mm_dtype), whh_h, preferred_element_type=jnp.float32)
        gc = gxc_scr[t].astype(jnp.float32) + jnp.dot(
            h_c.astype(mm_dtype), whh_c, preferred_element_type=jnp.float32)
        sh = jax.nn.sigmoid(gh[:, :3 * H])          # i | f | o
        sc = jax.nn.sigmoid(gc[:, :3 * H])
        gh_g = jnp.tanh(gh[:, 3 * H:])              # g
        gc_g = jnp.tanh(gc[:, 3 * H:])
        c_h = sh[:, H:2 * H] * c_h + sh[:, :H] * gh_g
        c_c = sc[:, H:2 * H] * c_c + sc[:, :H] * gc_g
        h_h = sh[:, 2 * H:3 * H] * jnp.tanh(c_h)
        h_c = sc[:, 2 * H:3 * H] * jnp.tanh(c_c)
        hsh_scr[t] = h_h.astype(sc_dtype)
        hsc_scr[t] = h_c.astype(sc_dtype)
        return h_h, c_h, h_c, c_c

    z = jnp.zeros((TB, H), jnp.float32)
    lax.fori_loop(0, Sm1, step, (z, z, z, z), unroll=min(8, max(Sm1, 1)))

    # ---- (3) bulk projection + cLN + residual + causal shift (per branch) ---
    def finish(x_t, hs_scr, wp_ref, bp_ref, gam_ref, bet_ref, o_ref):
        hs = hs_scr[...].reshape(Sm1 * TB, H)
        y = (jnp.dot(hs.astype(mm_dtype), wp_ref[...],
                     preferred_element_type=jnp.float32) + bp_ref[...])
        mean = jnp.mean(y, axis=-1, keepdims=True)
        var = jnp.mean(jnp.square(y - mean), axis=-1, keepdims=True)
        yn = gam_ref[...] * (y - mean) * lax.rsqrt(var + EPS) + bet_ref[...]
        res = jnp.transpose(x_t + yn.reshape(Sm1, TB, H), (1, 0, 2))  # (TB,Sm1,H)
        out = jnp.concatenate(                                         # causal shift
            [jnp.zeros((TB, 1, H), jnp.float32), res], axis=1)
        o_ref[...] = out.astype(o_ref.dtype)                           # single store

    finish(xh_t, hsh_scr, wp_h_ref, bp_h_ref, gam_h_ref, bet_h_ref, oh_ref)
    finish(xc_t, hsc_scr, wp_c_ref, bp_c_ref, gam_c_ref, bet_c_ref, oc_ref)


# ----------------------------------------------------------------------------
# Host-side helpers
# ----------------------------------------------------------------------------
def _prep_branch_params(params, matmul_dtype):
    """Permute LSTM gate order [i,f,g,o] -> [i,f,o,g] (columns of wih/whh and
    the combined bias identically) and pre-cast matmul weights."""
    wih_T, whh_T, b, wp_T, bp, gamma, beta = params

    def reorder(w):
        i, f, g, o = jnp.split(w, 4, axis=-1)
        return jnp.concatenate([i, f, o, g], axis=-1)

    return (reorder(wih_T).astype(matmul_dtype),
            reorder(whh_T).astype(matmul_dtype),
            reorder(b).astype(jnp.float32),
            wp_T.astype(matmul_dtype),
            bp.astype(jnp.float32),
            gamma.astype(jnp.float32),
            beta.astype(jnp.float32))


def _select_tile_and_vmem(B, S, H, *, in_itemsize, sc_itemsize, param_bytes):
    """Derive the batch tile TB from a per-generation VMEM budget and pick an
    explicit scoped-VMEM limit with headroom."""
    try:
        vmem_cap = int(pltpu.get_tpu_info().vmem_capacity_bytes)
    except Exception:
        vmem_cap = 64 * 1024 * 1024        # conservative: v7x per-core VMEM
    budget = (vmem_cap * 7) // 10          # headroom for compiler temporaries
    Sm1 = max(S - 1, 1)
    per_row = (
        4 * 2 * S * H * in_itemsize        # (2 in + 2 out) blocks, double-buffered
        + 2 * Sm1 * 4 * H * sc_itemsize    # gate staging scratch (h + c)
        + 2 * Sm1 * H * sc_itemsize        # hidden-state scratch (h + c)
        + 2 * Sm1 * 4 * H * 4              # f32 bulk gate values before the cast
        + 6 * Sm1 * H * 4                  # time-major staging / epilogue temporaries
    )
    tb = max(1, (budget - param_bytes) // per_row)
    tb = int(min(tb, B, 128))
    if tb >= 8:
        tb = (tb // 8) * 8                 # sublane-aligned batch tile
    if tb >= B and B >= 2:
        tb = -(-B // 2)                    # >=2 grid steps: pipelining / v7x megacore
    need = tb * per_row + param_bytes + (2 << 20)
    vmem_limit = max(32 << 20, (need * 3) // 2)
    vmem_limit = int(min(vmem_limit, (vmem_cap * 9) // 10))
    return tb, vmem_limit


# ----------------------------------------------------------------------------
# Wrapper (free reshapes only; no HBM transposes)
# ----------------------------------------------------------------------------
def mem_lstm_forward(h, c, params_h, params_c, S, *,
                     matmul_dtype=jnp.bfloat16, scratch_dtype=jnp.bfloat16):
    """h, c: (d=1, B*S, H).  Returns (h_out, c_out) with the same shape."""
    d, BS, H = h.shape
    assert d == 1, "this kernel implements the unidirectional (causal) MemLSTM"
    assert BS % S == 0, "B*S must be divisible by S"
    B = BS // S

    if S == 1:
        # The causal shift zeroes the only time step.
        return jnp.zeros_like(h), jnp.zeros_like(c)

    # (1, B*S, H) -> (B, S, H): a pure (free) reshape, identical to torch's
    # transpose(1,0).view(B, S, H) when d == 1.
    xh = h.reshape(B, S, H)
    xc = c.reshape(B, S, H)

    kp_h = _prep_branch_params(params_h, matmul_dtype)
    kp_c = _prep_branch_params(params_c, matmul_dtype)
    all_params = (*kp_h, *kp_c)
    param_bytes = sum(int(p.size) * p.dtype.itemsize for p in all_params)

    TB, vmem_limit = _select_tile_and_vmem(
        B, S, H,
        in_itemsize=h.dtype.itemsize,
        sc_itemsize=jnp.dtype(scratch_dtype).itemsize,
        param_bytes=param_bytes)

    grid = (pl.cdiv(B, TB),)
    x_spec = pl.BlockSpec((TB, S, H), lambda i: (i, 0, 0))
    param_specs = [pl.BlockSpec(p.shape, lambda i: (0, 0)) for p in all_params]
    Sm1 = S - 1

    # TODO(synk): for deployments with H < 128 a lane-dense repacking of the
    # output (folding S*H into the last dim) would avoid masked stores.
    oh, oc = pl.pallas_call(
        mem_lstm_kernel,
        out_shape=(jax.ShapeDtypeStruct((B, S, H), h.dtype),
                   jax.ShapeDtypeStruct((B, S, H), c.dtype)),
        grid=grid,
        in_specs=[x_spec, x_spec] + param_specs,
        out_specs=(x_spec, x_spec),
        scratch_shapes=[
            pltpu.VMEM((Sm1, TB, 4 * H), scratch_dtype),   # gates_x, h branch
            pltpu.VMEM((Sm1, TB, 4 * H), scratch_dtype),   # gates_x, c branch
            pltpu.VMEM((Sm1, TB, H), scratch_dtype),       # hidden states, h branch
            pltpu.VMEM((Sm1, TB, H), scratch_dtype),       # hidden states, c branch
        ],
        compiler_params=pltpu.CompilerParams(
            dimension_semantics=("parallel",),
            vmem_limit_bytes=vmem_limit),
    )(xh, xc, *kp_h, *kp_c)

    # (B, S, H) -> (1, B*S, H): again a free reshape.
    return oh.reshape(d, BS, H), oc.reshape(d, BS, H)


# ----------------------------------------------------------------------------
# Deterministic parameter init (PyTorch-style uniform +-1/sqrt(H))
# ----------------------------------------------------------------------------
def init_branch_params(key, H):
    ks = jax.random.split(key, 8)
    bound = float(H) ** -0.5
    u = lambda k, shape: jax.random.uniform(k, shape, jnp.float32, -bound, bound)
    wih_T = u(ks[0], (H, 4 * H))                         # weight_ih_l0^T
    whh_T = u(ks[1], (H, 4 * H))                         # weight_hh_l0^T
    b = (u(ks[2], (1, 4 * H)) + u(ks[3], (1, 4 * H)))    # bias_ih + bias_hh
    wp_T = u(ks[4], (H, H))                              # proj.weight^T
    bp = u(ks[5], (1, H))                                # proj.bias
    gamma = 1.0 + 0.1 * jax.random.normal(ks[6], (1, H), jnp.float32)  # cLN gamma
    beta = 0.1 * jax.random.normal(ks[7], (1, H), jnp.float32)         # cLN beta
    return (wih_T, whh_T, b, wp_T, bp, gamma, beta)


# ----------------------------------------------------------------------------
# Pure-JAX reference (torch gate order [i,f,g,o]) for correctness check
# ----------------------------------------------------------------------------
def ref_branch(x, wih_T, whh_T, b, wp_T, bp, gamma, beta):
    B, S, H = x.shape

    def step(carry, x_t):
        h_prev, c_prev = carry
        gates = x_t @ wih_T + h_prev @ whh_T + b
        i = jax.nn.sigmoid(gates[:, :H])
        f = jax.nn.sigmoid(gates[:, H:2 * H])
        g = jnp.tanh(gates[:, 2 * H:3 * H])
        o = jax.nn.sigmoid(gates[:, 3 * H:])
        c_new = f * c_prev + i * g
        h_new = o * jnp.tanh(c_new)
        return (h_new, c_new), h_new

    init = (jnp.zeros((B, H), jnp.float32), jnp.zeros((B, H), jnp.float32))
    _, hs = lax.scan(step, init, jnp.transpose(x, (1, 0, 2)))
    hs = jnp.transpose(hs, (1, 0, 2))                    # (B, S, H)
    y = hs @ wp_T + bp
    mean = y.mean(-1, keepdims=True)
    var = ((y - mean) ** 2).mean(-1, keepdims=True)
    yn = gamma * (y - mean) / jnp.sqrt(var + EPS) + beta
    out = x + yn
    return jnp.zeros_like(out).at[:, 1:, :].set(out[:, :-1, :])


def mem_lstm_reference(h, c, params_h, params_c, S):
    d, BS, H = h.shape
    B = BS // S

    def run(x, p):
        x_btd = jnp.transpose(x, (1, 0, 2)).reshape(B, S, d * H)
        y = ref_branch(x_btd, *p)
        return jnp.transpose(y.reshape(B * S, d, H), (1, 0, 2))

    return run(h, params_h), run(c, params_c)


def _rel_l2(a, b):
    num = jnp.sqrt(jnp.sum(jnp.square((a - b).astype(jnp.float32))))
    den = jnp.sqrt(jnp.sum(jnp.square(b.astype(jnp.float32)))) + 1e-12
    return float(num / den)


# ----------------------------------------------------------------------------
if __name__ == "__main__":
    B, S, H, d = 2, 8, 32, 1

    key = jax.random.PRNGKey(0)
    k_h, k_c, k_ph, k_pc = jax.random.split(key, 4)

    h_in = jax.random.normal(k_h, (d, B * S, H), jnp.float32)
    c_in = jax.random.normal(k_c, (d, B * S, H), jnp.float32)

    params_h = init_branch_params(k_ph, H)   # h_net + h_norm
    params_c = init_branch_params(k_pc, H)   # c_net + c_norm

    h_ref, c_ref = mem_lstm_reference(h_in, c_in, params_h, params_c, S)

    # Exact configuration (f32 matmuls + f32 staging scratch): tight check.
    h32, c32 = mem_lstm_forward(h_in, c_in, params_h, params_c, S,
                                matmul_dtype=jnp.float32,
                                scratch_dtype=jnp.float32)
    jax.block_until_ready((h32, c32))
    assert h32.shape == (d, B * S, H) and c32.shape == (d, B * S, H)
    assert jnp.allclose(h32, h_ref, atol=2e-3, rtol=2e-3)
    assert jnp.allclose(c32, c_ref, atol=2e-3, rtol=2e-3)

    # Production configuration (bf16 matmul operands + bf16 staging scratch,
    # f32 accumulation / state / cLN stats): coarse sanity check vs f32 ref.
    hbf, cbf = mem_lstm_forward(h_in, c_in, params_h, params_c, S,
                                matmul_dtype=jnp.bfloat16,
                                scratch_dtype=jnp.bfloat16)
    jax.block_until_ready((hbf, cbf))
    assert hbf.shape == (d, B * S, H) and cbf.shape == (d, B * S, H)
    assert bool(jnp.all(jnp.isfinite(hbf))) and bool(jnp.all(jnp.isfinite(cbf)))
    assert _rel_l2(hbf, h_ref) < 0.05
    assert _rel_l2(cbf, c_ref) < 0.05

    print("KERNEL_OK")
</pallas_src>

<mosaic_0001>
module attributes {stable_mosaic.version = 11 : i64} {
  func.func @mem_lstm_kernel(%arg0: i32, %arg1: memref<1x8x32xf32, #tpu.memory_space<vmem>>, %arg2: memref<1x8x32xf32, #tpu.memory_space<vmem>>, %arg3: memref<32x128xf32, #tpu.memory_space<vmem>>, %arg4: memref<32x128xf32, #tpu.memory_space<vmem>>, %arg5: memref<1x128xf32, #tpu.memory_space<vmem>>, %arg6: memref<32x32xf32, #tpu.memory_space<vmem>>, %arg7: memref<1x32xf32, #tpu.memory_space<vmem>>, %arg8: memref<1x32xf32, #tpu.memory_space<vmem>>, %arg9: memref<1x32xf32, #tpu.memory_space<vmem>>, %arg10: memref<32x128xf32, #tpu.memory_space<vmem>>, %arg11: memref<32x128xf32, #tpu.memory_space<vmem>>, %arg12: memref<1x128xf32, #tpu.memory_space<vmem>>, %arg13: memref<32x32xf32, #tpu.memory_space<vmem>>, %arg14: memref<1x32xf32, #tpu.memory_space<vmem>>, %arg15: memref<1x32xf32, #tpu.memory_space<vmem>>, %arg16: memref<1x32xf32, #tpu.memory_space<vmem>>, %arg17: memref<1x8x32xf32, #tpu.memory_space<vmem>>, %arg18: memref<1x8x32xf32, #tpu.memory_space<vmem>>, %arg19: memref<7x1x128xf32, #tpu.memory_space<vmem>>, %arg20: memref<7x1x128xf32, #tpu.memory_space<vmem>>, %arg21: memref<7x1x32xf32, #tpu.memory_space<vmem>>, %arg22: memref<7x1x32xf32, #tpu.memory_space<vmem>>) attributes {dimension_semantics = [#tpu.dimension_semantics<parallel>], iteration_bounds = array<i64: 2>, scalar_prefetch = 0 : i64, scratch_operands = 4 : i64, tpu.core_type = #tpu.core_type<tc>, window_params = [{transform_indices = @transform_0, window_bounds = array<i64: 1, 8, 32>}, {transform_indices = @transform_1, window_bounds = array<i64: 1, 8, 32>}, {pipeline_mode = #tpu.pipeline_mode<synchronous>, transform_indices = @transform_2, window_bounds = array<i64: 32, 128>}, {pipeline_mode = #tpu.pipeline_mode<synchronous>, transform_indices = @transform_3, window_bounds = array<i64: 32, 128>}, {pipeline_mode = #tpu.pipeline_mode<synchronous>, transform_indices = @transform_4, window_bounds = array<i64: 1, 128>}, {pipeline_mode = #tpu.pipeline_mode<synchronous>, transform_indices = @transform_5, window_bounds = array<i64: 32, 32>}, {pipeline_mode = #tpu.pipeline_mode<synchronous>, transform_indices = @transform_6, window_bounds = array<i64: 1, 32>}, {pipeline_mode = #tpu.pipeline_mode<synchronous>, transform_indices = @transform_7, window_bounds = array<i64: 1, 32>}, {pipeline_mode = #tpu.pipeline_mode<synchronous>, transform_indices = @transform_8, window_bounds = array<i64: 1, 32>}, {pipeline_mode = #tpu.pipeline_mode<synchronous>, transform_indices = @transform_9, window_bounds = array<i64: 32, 128>}, {pipeline_mode = #tpu.pipeline_mode<synchronous>, transform_indices = @transform_10, window_bounds = array<i64: 32, 128>}, {pipeline_mode = #tpu.pipeline_mode<synchronous>, transform_indices = @transform_11, window_bounds = array<i64: 1, 128>}, {pipeline_mode = #tpu.pipeline_mode<synchronous>, transform_indices = @transform_12, window_bounds = array<i64: 32, 32>}, {pipeline_mode = #tpu.pipeline_mode<synchronous>, transform_indices = @transform_13, window_bounds = array<i64: 1, 32>}, {pipeline_mode = #tpu.pipeline_mode<synchronous>, transform_indices = @transform_14, window_bounds = array<i64: 1, 32>}, {pipeline_mode = #tpu.pipeline_mode<synchronous>, transform_indices = @transform_15, window_bounds = array<i64: 1, 32>}, {transform_indices = @transform_16, window_bounds = array<i64: 1, 8, 32>}, {transform_indices = @transform_17, window_bounds = array<i64: 1, 8, 32>}]} {
    %c0 = arith.constant 0 : index
    %c0_0 = arith.constant 0 : index
    %c0_1 = arith.constant 0 : index
    %0 = vector.load %arg1[%c0, %c0_0, %c0_1] : memref<1x8x32xf32, #tpu.memory_space<vmem>>, vector<1x8x32xf32>
    %c0_2 = arith.constant 0 : index
    %c0_3 = arith.constant 0 : index
    %c0_4 = arith.constant 0 : index
    %1 = vector.load %arg2[%c0_2, %c0_3, %c0_4] : memref<1x8x32xf32, #tpu.memory_space<vmem>>, vector<1x8x32xf32>
    %2 = vector.extract_strided_slice %0 {offsets = [0, 0, 0], sizes = [1, 7, 32], strides = [1, 1, 1]} : vector<1x8x32xf32> to vector<1x7x32xf32>
    %3 = tpu.transpose %2, [1, 0, 2] : vector<1x7x32xf32> -> vector<7x1x32xf32>
    %4 = vector.extract_strided_slice %1 {offsets = [0, 0, 0], sizes = [1, 7, 32], strides = [1, 1, 1]} : vector<1x8x32xf32> to vector<1x7x32xf32>
    %5 = tpu.transpose %4, [1, 0, 2] : vector<1x7x32xf32> -> vector<7x1x32xf32>
    %6 = vector.shape_cast %3 : vector<7x1x32xf32> to vector<7x32xf32>
    %c0_5 = arith.constant 0 : index
    %c0_6 = arith.constant 0 : index
    %7 = vector.load %arg3[%c0_5, %c0_6] : memref<32x128xf32, #tpu.memory_space<vmem>>, vector<32x128xf32>
    %cst = arith.constant dense<0.000000e+00> : vector<7x128xf32>
    %8 = tpu.matmul %6, %7, %cst {dimension_numbers = #tpu.dot_dimension_numbers<[1], [0], [0], [1], [0, 0, 1, 1], [], []>} : vector<7x32xf32>, vector<32x128xf32>, vector<7x128xf32> -> vector<7x128xf32>
    %c0_7 = arith.constant 0 : index
    %c0_8 = arith.constant 0 : index
    %9 = vector.load %arg5[%c0_7, %c0_8] : memref<1x128xf32, #tpu.memory_space<vmem>>, vector<1x128xf32>
    %10 = vector.broadcast %9 : vector<1x128xf32> to vector<7x128xf32>
    %11 = arith.addf %8, %10 : vector<7x128xf32>
    %12 = vector.shape_cast %11 : vector<7x128xf32> to vector<7x1x128xf32>
    %c0_9 = arith.constant 0 : index
    %c0_10 = arith.constant 0 : index
    %c0_11 = arith.constant 0 : index
    %13 = vector.load %arg19[%c0_9, %c0_10, %c0_11] : memref<7x1x128xf32, #tpu.memory_space<vmem>>, vector<7x1x128xf32>
    tpu.vector_store %arg19[%c0_9, %c0_10, %c0_11], %12 {strides = array<i32>} : memref<7x1x128xf32, #tpu.memory_space<vmem>>, vector<7x1x128xf32>,
    %14 = vector.shape_cast %5 : vector<7x1x32xf32> to vector<7x32xf32>
    %c0_12 = arith.constant 0 : index
    %c0_13 = arith.constant 0 : index
    %15 = vector.load %arg10[%c0_12, %c0_13] : memref<32x128xf32, #tpu.memory_space<vmem>>, vector<32x128xf32>
    %cst_14 = arith.constant dense<0.000000e+00> : vector<7x128xf32>
    %16 = tpu.matmul %14, %15, %cst_14 {dimension_numbers = #tpu.dot_dimension_numbers<[1], [0], [0], [1], [0, 0, 1, 1], [], []>} : vector<7x32xf32>, vector<32x128xf32>, vector<7x128xf32> -> vector<7x128xf32>
    %c0_15 = arith.constant 0 : index
    %c0_16 = arith.constant 0 : index
    %17 = vector.load %arg12[%c0_15, %c0_16] : memref<1x128xf32, #tpu.memory_space<vmem>>, vector<1x128xf32>
    %18 = vector.broadcast %17 : vector<1x128xf32> to vector<7x128xf32>
    %19 = arith.addf %16, %18 : vector<7x128xf32>
    %20 = vector.shape_cast %19 : vector<7x128xf32> to vector<7x1x128xf32>
    %c0_17 = arith.constant 0 : index
    %c0_18 = arith.constant 0 : index
    %c0_19 = arith.constant 0 : index
    %21 = vector.load %arg20[%c0_17, %c0_18, %c0_19] : memref<7x1x128xf32, #tpu.memory_space<vmem>>, vector<7x1x128xf32>
    tpu.vector_store %arg20[%c0_17, %c0_18, %c0_19], %20 {strides = array<i32>} : memref<7x1x128xf32, #tpu.memory_space<vmem>>, vector<7x1x128xf32>,
    %c0_20 = arith.constant 0 : index
    %c0_21 = arith.constant 0 : index
    %22 = vector.load %arg4[%c0_20, %c0_21] : memref<32x128xf32, #tpu.memory_space<vmem>>, vector<32x128xf32>
    %c0_22 = arith.constant 0 : index
    %c0_23 = arith.constant 0 : index
    %23 = vector.load %arg11[%c0_22, %c0_23] : memref<32x128xf32, #tpu.memory_space<vmem>>, vector<32x128xf32>
    %cst_24 = arith.constant 0.000000e+00 : f32
    %24 = vector.broadcast %cst_24 : f32 to vector<1x32xf32>
    %c0_i32 = arith.constant 0 : i32
    %25 = arith.index_cast %c0_i32 : i32 to index
    %c0_25 = arith.constant 0 : index
    %c0_26 = arith.constant 0 : index
    %26 = vector.load %arg19[%25, %c0_25, %c0_26] : memref<7x1x128xf32, #tpu.memory_space<vmem>>, vector<1x1x128xf32>
    %27 = vector.shape_cast %26 : vector<1x1x128xf32> to vector<1x128xf32>
    %cst_27 = arith.constant dense<0.000000e+00> : vector<1x128xf32>
    %28 = tpu.matmul %24, %22, %cst_27 {dimension_numbers = #tpu.dot_dimension_numbers<[1], [0], [0], [1], [0, 0, 1, 1], [], []>} : vector<1x32xf32>, vector<32x128xf32>, vector<1x128xf32> -> vector<1x128xf32>
    %29 = arith.addf %27, %28 : vector<1x128xf32>
    %30 = arith.index_cast %c0_i32 : i32 to index
    %c0_28 = arith.constant 0 : index
    %c0_29 = arith.constant 0 : index
    %31 = vector.load %arg20[%30, %c0_28, %c0_29] : memref<7x1x128xf32, #tpu.memory_space<vmem>>, vector<1x1x128xf32>
    %32 = vector.shape_cast %31 : vector<1x1x128xf32> to vector<1x128xf32>
    %cst_30 = arith.constant dense<0.000000e+00> : vector<1x128xf32>
    %33 = tpu.matmul %24, %23, %cst_30 {dimension_numbers = #tpu.dot_dimension_numbers<[1], [0], [0], [1], [0, 0, 1, 1], [], []>} : vector<1x32xf32>, vector<32x128xf32>, vector<1x128xf32> -> vector<1x128xf32>
    %34 = arith.addf %32, %33 : vector<1x128xf32>
    %35 = vector.extract_strided_slice %29 {offsets = [0, 0], sizes = [1, 96], strides = [1, 1]} : vector<1x128xf32> to vector<1x96xf32>
    %36 = arith.negf %35 : vector<1x96xf32>
    %37 = math.exp %36 : vector<1x96xf32>
    %cst_31 = arith.constant 1.000000e+00 : f32
    %38 = vector.broadcast %cst_31 : f32 to vector<1x96xf32>
    %39 = arith.addf %38, %37 : vector<1x96xf32>
    %40 = arith.divf %38, %39 : vector<1x96xf32>
    %41 = vector.extract_strided_slice %34 {offsets = [0, 0], sizes = [1, 96], strides = [1, 1]} : vector<1x128xf32> to vector<1x96xf32>
    %42 = arith.negf %41 : vector<1x96xf32>
    %43 = math.exp %42 : vector<1x96xf32>
    %cst_32 = arith.constant 1.000000e+00 : f32
    %44 = vector.broadcast %cst_32 : f32 to vector<1x96xf32>
    %45 = arith.addf %44, %43 : vector<1x96xf32>
    %46 = arith.divf %44, %45 : vector<1x96xf32>
    %47 = vector.extract_strided_slice %29 {offsets = [0, 96], sizes = [1, 32], strides = [1, 1]} : vector<1x128xf32> to vector<1x32xf32>
    %48 = math.tanh %47 : vector<1x32xf32>
    %49 = vector.extract_strided_slice %34 {offsets = [0, 96], sizes = [1, 32], strides = [1, 1]} : vector<1x128xf32> to vector<1x32xf32>
    %50 = math.tanh %49 : vector<1x32xf32>
    %51 = vector.extract_strided_slice %40 {offsets = [0, 32], sizes = [1, 32], strides = [1, 1]} : vector<1x96xf32> to vector<1x32xf32>
    %52 = arith.mulf %51, %24 : vector<1x32xf32>
    %53 = vector.extract_strided_slice %40 {offsets = [0, 0], sizes = [1, 32], strides = [1, 1]} : vector<1x96xf32> to vector<1x32xf32>
    %54 = arith.mulf %53, %48 : vector<1x32xf32>
    %55 = arith.addf %52, %54 : vector<1x32xf32>
    %56 = vector.extract_strided_slice %46 {offsets = [0, 32], sizes = [1, 32], strides = [1, 1]} : vector<1x96xf32> to vector<1x32xf32>
    %57 = arith.mulf %56, %24 : vector<1x32xf32>
    %58 = vector.extract_strided_slice %46 {offsets = [0, 0], sizes = [1, 32], strides = [1, 1]} : vector<1x96xf32> to vector<1x32xf32>
    %59 = arith.mulf %58, %50 : vector<1x32xf32>
    %60 = arith.addf %57, %59 : vector<1x32xf32>
    %61 = vector.extract_strided_slice %40 {offsets = [0, 64], sizes = [1, 32], strides = [1, 1]} : vector<1x96xf32> to vector<1x32xf32>
    %62 = math.tanh %55 : vector<1x32xf32>
    %63 = arith.mulf %61, %62 : vector<1x32xf32>
    %64 = vector.extract_strided_slice %46 {offsets = [0, 64], sizes = [1, 32], strides = [1, 1]} : vector<1x96xf32> to vector<1x32xf32>
    %65 = math.tanh %60 : vector<1x32xf32>
    %66 = arith.mulf %64, %65 : vector<1x32xf32>
    %67 = arith.index_cast %c0_i32 : i32 to index
    %c0_33 = arith.constant 0 : index
    %c0_34 = arith.constant 0 : index
    %68 = vector.load %arg21[%67, %c0_33, %c0_34] : memref<7x1x32xf32, #tpu.memory_space<vmem>>, vector<1x1x32xf32>
    %69 = vector.shape_cast %68 : vector<1x1x32xf32> to vector<1x32xf32>
    %70 = vector.shape_cast %63 : vector<1x32xf32> to vector<1x1x32xf32>
    tpu.vector_store %arg21[%67, %c0_33, %c0_34], %70 {strides = array<i32>} : memref<7x1x32xf32, #tpu.memory_space<vmem>>, vector<1x1x32xf32>,
    %71 = arith.index_cast %c0_i32 : i32 to index
    %c0_35 = arith.constant 0 : index
    %c0_36 = arith.constant 0 : index
    %72 = vector.load %arg22[%71, %c0_35, %c0_36] : memref<7x1x32xf32, #tpu.memory_space<vmem>>, vector<1x1x32xf32>
    %73 = vector.shape_cast %72 : vector<1x1x32xf32> to vector<1x32xf32>
    %74 = vector.shape_cast %66 : vector<1x32xf32> to vector<1x1x32xf32>
    tpu.vector_store %arg22[%71, %c0_35, %c0_36], %74 {strides = array<i32>} : memref<7x1x32xf32, #tpu.memory_space<vmem>>, vector<1x1x32xf32>,
    %c1_i32 = arith.constant 1 : i32
    %75 = arith.index_cast %c1_i32 : i32 to index
    %c0_37 = arith.constant 0 : index
    %c0_38 = arith.constant 0 : index
    %76 = vector.load %arg19[%75, %c0_37, %c0_38] : memref<7x1x128xf32, #tpu.memory_space<vmem>>, vector<1x1x128xf32>
    %77 = vector.shape_cast %76 : vector<1x1x128xf32> to vector<1x128xf32>
    %cst_39 = arith.constant dense<0.000000e+00> : vector<1x128xf32>
    %78 = tpu.matmul %63, %22, %cst_39 {dimension_numbers = #tpu.dot_dimension_numbers<[1], [0], [0], [1], [0, 0, 1, 1], [], []>} : vector<1x32xf32>, vector<32x128xf32>, vector<1x128xf32> -> vector<1x128xf32>
    %79 = arith.addf %77, %78 : vector<1x128xf32>
    %80 = arith.index_cast %c1_i32 : i32 to index
    %c0_40 = arith.constant 0 : index
    %c0_41 = arith.constant 0 : index
    %81 = vector.load %arg20[%80, %c0_40, %c0_41] : memref<7x1x128xf32, #tpu.memory_space<vmem>>, vector<1x1x128xf32>
    %82 = vector.shape_cast %81 : vector<1x1x128xf32> to vector<1x128xf32>
    %cst_42 = arith.constant dense<0.000000e+00> : vector<1x128xf32>
    %83 = tpu.matmul %66, %23, %cst_42 {dimension_numbers = #tpu.dot_dimension_numbers<[1], [0], [0], [1], [0, 0, 1, 1], [], []>} : vector<1x32xf32>, vector<32x128xf32>, vector<1x128xf32> -> vector<1x128xf32>
    %84 = arith.addf %82, %83 : vector<1x128xf32>
    %85 = vector.extract_strided_slice %79 {offsets = [0, 0], sizes = [1, 96], strides = [1, 1]} : vector<1x128xf32> to vector<1x96xf32>
    %86 = arith.negf %85 : vector<1x96xf32>
    %87 = math.exp %86 : vector<1x96xf32>
    %cst_43 = arith.constant 1.000000e+00 : f32
    %88 = vector.broadcast %cst_43 : f32 to vector<1x96xf32>
    %89 = arith.addf %88, %87 : vector<1x96xf32>
    %90 = arith.divf %88, %89 : vector<1x96xf32>
    %91 = vector.extract_strided_slice %84 {offsets = [0, 0], sizes = [1, 96], strides = [1, 1]} : vector<1x128xf32> to vector<1x96xf32>
    %92 = arith.negf %91 : vector<1x96xf32>
    %93 = math.exp %92 : vector<1x96xf32>
    %cst_44 = arith.constant 1.000000e+00 : f32
    %94 = vector.broadcast %cst_44 : f32 to vector<1x96xf32>
    %95 = arith.addf %94, %93 : vector<1x96xf32>
    %96 = arith.divf %94, %95 : vector<1x96xf32>
    %97 = vector.extract_strided_slice %79 {offsets = [0, 96], sizes = [1, 32], strides = [1, 1]} : vector<1x128xf32> to vector<1x32xf32>
    %98 = math.tanh %97 : vector<1x32xf32>
    %99 = vector.extract_strided_slice %84 {offsets = [0, 96], sizes = [1, 32], strides = [1, 1]} : vector<1x128xf32> to vector<1x32xf32>
    %100 = math.tanh %99 : vector<1x32xf32>
    %101 = vector.extract_strided_slice %90 {offsets = [0, 32], sizes = [1, 32], strides = [1, 1]} : vector<1x96xf32> to vector<1x32xf32>
    %102 = arith.mulf %101, %55 : vector<1x32xf32>
    %103 = vector.extract_strided_slice %90 {offsets = [0, 0], sizes = [1, 32], strides = [1, 1]} : vector<1x96xf32> to vector<1x32xf32>
    %104 = arith.mulf %103, %98 : vector<1x32xf32>
    %105 = arith.addf %102, %104 : vector<1x32xf32>
    %106 = vector.extract_strided_slice %96 {offsets = [0, 32], sizes = [1, 32], strides = [1, 1]} : vector<1x96xf32> to vector<1x32xf32>
    %107 = arith.mulf %106, %60 : vector<1x32xf32>
    %108 = vector.extract_strided_slice %96 {offsets = [0, 0], sizes = [1, 32], strides = [1, 1]} : vector<1x96xf32> to vector<1x32xf32>
    %109 = arith.mulf %108, %100 : vector<1x32xf32>
    %110 = arith.addf %107, %109 : vector<1x32xf32>
    %111 = vector.extract_strided_slice %90 {offsets = [0, 64], sizes = [1, 32], strides = [1, 1]} : vector<1x96xf32> to vector<1x32xf32>
    %112 = math.tanh %105 : vector<1x32xf32>
    %113 = arith.mulf %111, %112 : vector<1x32xf32>
    %114 = vector.extract_strided_slice %96 {offsets = [0, 64], sizes = [1, 32], strides = [1, 1]} : vector<1x96xf32> to vector<1x32xf32>
    %115 = math.tanh %110 : vector<1x32xf32>
    %116 = arith.mulf %114, %115 : vector<1x32xf32>
    %117 = arith.index_cast %c1_i32 : i32 to index
    %c0_45 = arith.constant 0 : index
    %c0_46 = arith.constant 0 : index
    %118 = vector.load %arg21[%117, %c0_45, %c0_46] : memref<7x1x32xf32, #tpu.memory_space<vmem>>, vector<1x1x32xf32>
    %119 = vector.shape_cast %118 : vector<1x1x32xf32> to vector<1x32xf32>
    %120 = vector.shape_cast %113 : vector<1x32xf32> to vector<1x1x32xf32>
    tpu.vector_store %arg21[%117, %c0_45, %c0_46], %120 {strides = array<i32>} : memref<7x1x32xf32, #tpu.memory_space<vmem>>, vector<1x1x32xf32>,
    %121 = arith.index_cast %c1_i32 : i32 to index
    %c0_47 = arith.constant 0 : index
    %c0_48 = arith.constant 0 : index
    %122 = vector.load %arg22[%121, %c0_47, %c0_48] : memref<7x1x32xf32, #tpu.memory_space<vmem>>, vector<1x1x32xf32>
    %123 = vector.shape_cast %122 : vector<1x1x32xf32> to vector<1x32xf32>
    %124 = vector.shape_cast %116 : vector<1x32xf32> to vector<1x1x32xf32>
    tpu.vector_store %arg22[%121, %c0_47, %c0_48], %124 {strides = array<i32>} : memref<7x1x32xf32, #tpu.memory_space<vmem>>, vector<1x1x32xf32>,
    %c2_i32 = arith.constant 2 : i32
    %125 = arith.index_cast %c2_i32 : i32 to index
    %c0_49 = arith.constant 0 : index
    %c0_50 = arith.constant 0 : index
    %126 = vector.load %arg19[%125, %c0_49, %c0_50] : memref<7x1x128xf32, #tpu.memory_space<vmem>>, vector<1x1x128xf32>
    %127 = vector.shape_cast %126 : vector<1x1x128xf32> to vector<1x128xf32>
    %cst_51 = arith.constant dense<0.000000e+00> : vector<1x128xf32>
    %128 = tpu.matmul %113, %22, %cst_51 {dimension_numbers = #tpu.dot_dimension_numbers<[1], [0], [0], [1], [0, 0, 1, 1], [], []>} : vector<1x32xf32>, vector<32x128xf32>, vector<1x128xf32> -> vector<1x128xf32>
    %129 = arith.addf %127, %128 : vector<1x128xf32>
    %130 = arith.index_cast %c2_i32 : i32 to index
    %c0_52 = arith.constant 0 : index
    %c0_53 = arith.constant 0 : index
    %131 = vector.load %arg20[%130, %c0_52, %c0_53] : memref<7x1x128xf32, #tpu.memory_space<vmem>>, vector<1x1x128xf32>
    %132 = vector.shape_cast %131 : vector<1x1x128xf32> to vector<1x128xf32>
    %cst_54 = arith.constant dense<0.000000e+00> : vector<1x128xf32>
    %133 = tpu.matmul %116, %23, %cst_54 {dimension_numbers = #tpu.dot_dimension_numbers<[1], [0], [0], [1], [0, 0, 1, 1], [], []>} : vector<1x32xf32>, vector<32x128xf32>, vector<1x128xf32> -> vector<1x128xf32>
    %134 = arith.addf %132, %133 : vector<1x128xf32>
    %135 = vector.extract_strided_slice %129 {offsets = [0, 0], sizes = [1, 96], strides = [1, 1]} : vector<1x128xf32> to vector<1x96xf32>
    %136 = arith.negf %135 : vector<1x96xf32>
    %137 = math.exp %136 : vector<1x96xf32>
    %cst_55 = arith.constant 1.000000e+00 : f32
    %138 = vector.broadcast %cst_55 : f32 to vector<1x96xf32>
    %139 = arith.addf %138, %137 : vector<1x96xf32>
    %140 = arith.divf %138, %139 : vector<1x96xf32>
    %141 = vector.extract_strided_slice %134 {offsets = [0, 0], sizes = [1, 96], strides = [1, 1]} : vector<1x128xf32> to vector<1x96xf32>
    %142 = arith.negf %141 : vector<1x96xf32>
    %143 = math.exp %142 : vector<1x96xf32>
    %cst_56 = arith.constant 1.000000e+00 : f32
    %144 = vector.broadcast %cst_56 : f32 to vector<1x96xf32>
    %145 = arith.addf %144, %143 : vector<1x96xf32>
    %146 = arith.divf %144, %145 : vector<1x96xf32>
    %147 = vector.extract_strided_slice %129 {offsets = [0, 96], sizes = [1, 32], strides = [1, 1]} : vector<1x128xf32> to vector<1x32xf32>
    %148 = math.tanh %147 : vector<1x32xf32>
    %149 = vector.extract_strided_slice %134 {offsets = [0, 96], sizes = [1, 32], strides = [1, 1]} : vector<1x128xf32> to vector<1x32xf32>
    %150 = math.tanh %149 : vector<1x32xf32>
    %151 = vector.extract_strided_slice %140 {offsets = [0, 32], sizes = [1, 32], strides = [1, 1]} : vector<1x96xf32> to vector<1x32xf32>
    %152 = arith.mulf %151, %105 : vector<1x32xf32>
    %153 = vector.extract_strided_slice %140 {offsets = [0, 0], sizes = [1, 32], strides = [1, 1]} : vector<1x96xf32> to vector<1x32xf32>
    %154 = arith.mulf %153, %148 : vector<1x32xf32>
    %155 = arith.addf %152, %154 : vector<1x32xf32>
    %156 = vector.extract_strided_slice %146 {offsets = [0, 32], sizes = [1, 32], strides = [1, 1]} : vector<1x96xf32> to vector<1x32xf32>
    %157 = arith.mulf %156, %110 : vector<1x32xf32>
    %158 = vector.extract_strided_slice %146 {offsets = [0, 0], sizes = [1, 32], strides = [1, 1]} : vector<1x96xf32> to vector<1x32xf32>
    %159 = arith.mulf %158, %150 : vector<1x32xf32>
    %160 = arith.addf %157, %159 : vector<1x32xf32>
    %161 = vector.extract_strided_slice %140 {offsets = [0, 64], sizes = [1, 32], strides = [1, 1]} : vector<1x96xf32> to vector<1x32xf32>
    %162 = math.tanh %155 : vector<1x32xf32>
    %163 = arith.mulf %161, %162 : vector<1x32xf32>
    %164 = vector.extract_strided_slice %146 {offsets = [0, 64], sizes = [1, 32], strides = [1, 1]} : vector<1x96xf32> to vector<1x32xf32>
    %165 = math.tanh %160 : vector<1x32xf32>
    %166 = arith.mulf %164, %165 : vector<1x32xf32>
    %167 = arith.index_cast %c2_i32 : i32 to index
    %c0_57 = arith.constant 0 : index
    %c0_58 = arith.constant 0 : index
    %168 = vector.load %arg21[%167, %c0_57, %c0_58] : memref<7x1x32xf32, #tpu.memory_space<vmem>>, vector<1x1x32xf32>
    %169 = vector.shape_cast %168 : vector<1x1x32xf32> to vector<1x32xf32>
    %170 = vector.shape_cast %163 : vector<1x32xf32> to vector<1x1x32xf32>
    tpu.vector_store %arg21[%167, %c0_57, %c0_58], %170 {strides = array<i32>} : memref<7x1x32xf32, #tpu.memory_space<vmem>>, vector<1x1x32xf32>,
    %171 = arith.index_cast %c2_i32 : i32 to index
    %c0_59 = arith.constant 0 : index
    %c0_60 = arith.constant 0 : index
    %172 = vector.load %arg22[%171, %c0_59, %c0_60] : memref<7x1x32xf32, #tpu.memory_space<vmem>>, vector<1x1x32xf32>
    %173 = vector.shape_cast %172 : vector<1x1x32xf32> to vector<1x32xf32>
    %174 = vector.shape_cast %166 : vector<1x32xf32> to vector<1x1x32xf32>
    tpu.vector_store %arg22[%171, %c0_59, %c0_60], %174 {strides = array<i32>} : memref<7x1x32xf32, #tpu.memory_space<vmem>>, vector<1x1x32xf32>,
    %c3_i32 = arith.constant 3 : i32
    %175 = arith.index_cast %c3_i32 : i32 to index
    %c0_61 = arith.constant 0 : index
    %c0_62 = arith.constant 0 : index
    %176 = vector.load %arg19[%175, %c0_61, %c0_62] : memref<7x1x128xf32, #tpu.memory_space<vmem>>, vector<1x1x128xf32>
    %177 = vector.shape_cast %176 : vector<1x1x128xf32> to vector<1x128xf32>
    %cst_63 = arith.constant dense<0.000000e+00> : vector<1x128xf32>
    %178 = tpu.matmul %163, %22, %cst_63 {dimension_numbers = #tpu.dot_dimension_numbers<[1], [0], [0], [1], [0, 0, 1, 1], [], []>} : vector<1x32xf32>, vector<32x128xf32>, vector<1x128xf32> -> vector<1x128xf32>
    %179 = arith.addf %177, %178 : vector<1x128xf32>
    %180 = arith.index_cast %c3_i32 : i32 to index
    %c0_64 = arith.constant 0 : index
    %c0_65 = arith.constant 0 : index
    %181 = vector.load %arg20[%180, %c0_64, %c0_65] : memref<7x1x128xf32, #tpu.memory_space<vmem>>, vector<1x1x128xf32>
    %182 = vector.shape_cast %181 : vector<1x1x128xf32> to vector<1x128xf32>
    %cst_66 = arith.constant dense<0.000000e+00> : vector<1x128xf32>
    %183 = tpu.matmul %166, %23, %cst_66 {dimension_numbers = #tpu.dot_dimension_numbers<[1], [0], [0], [1], [0, 0, 1, 1], [], []>} : vector<1x32xf32>, vector<32x128xf32>, vector<1x128xf32> -> vector<1x128xf32>
    %184 = arith.addf %182, %183 : vector<1x128xf32>
    %185 = vector.extract_strided_slice %179 {offsets = [0, 0], sizes = [1, 96], strides = [1, 1]} : vector<1x128xf32> to vector<1x96xf32>
    %186 = arith.negf %185 : vector<1x96xf32>
    %187 = math.exp %186 : vector<1x96xf32>
    %cst_67 = arith.constant 1.000000e+00 : f32
    %188 = vector.broadcast %cst_67 : f32 to vector<1x96xf32>
    %189 = arith.addf %188, %187 : vector<1x96xf32>
    %190 = arith.divf %188, %189 : vector<1x96xf32>
    %191 = vector.extract_strided_slice %184 {offsets = [0, 0], sizes = [1, 96], strides = [1, 1]} : vector<1x128xf32> to vector<1x96xf32>
    %192 = arith.negf %191 : vector<1x96xf32>
    %193 = math.exp %192 : vector<1x96xf32>
    %cst_68 = arith.constant 1.000000e+00 : f32
    %194 = vector.broadcast %cst_68 : f32 to vector<1x96xf32>
    %195 = arith.addf %194, %193 : vector<1x96xf32>
    %196 = arith.divf %194, %195 : vector<1x96xf32>
    %197 = vector.extract_strided_slice %179 {offsets = [0, 96], sizes = [1, 32], strides = [1, 1]} : vector<1x128xf32> to vector<1x32xf32>
    %198 = math.tanh %197 : vector<1x32xf32>
    %199 = vector.extract_strided_slice %184 {offsets = [0, 96], sizes = [1, 32], strides = [1, 1]} : vector<1x128xf32> to vector<1x32xf32>
    %200 = math.tanh %199 : vector<1x32xf32>
    %201 = vector.extract_strided_slice %190 {offsets = [0, 32], sizes = [1, 32], strides = [1, 1]} : vector<1x96xf32> to vector<1x32xf32>
    %202 = arith.mulf %201, %155 : vector<1x32xf32>
    %203 = vector.extract_strided_slice %190 {offsets = [0, 0], sizes = [1, 32], strides = [1, 1]} : vector<1x96xf32> to vector<1x32xf32>
    %204 = arith.mulf %203, %198 : vector<1x32xf32>
    %205 = arith.addf %202, %204 : vector<1x32xf32>
    %206 = vector.extract_strided_slice %196 {offsets = [0, 32], sizes = [1, 32], strides = [1, 1]} : vector<1x96xf32> to vector<1x32xf32>
    %207 = arith.mulf %206, %160 : vector<1x32xf32>
    %208 = vector.extract_strided_slice %196 {offsets = [0, 0], sizes = [1, 32], strides = [1, 1]} : vector<1x96xf32> to vector<1x32xf32>
    %209 = arith.mulf %208, %200 : vector<1x32xf32>
    %210 = arith.addf %207, %209 : vector<1x32xf32>
    %211 = vector.extract_strided_slice %190 {offsets = [0, 64], sizes = [1, 32], strides = [1, 1]} : vector<1x96xf32> to vector<1x32xf32>
    %212 = math.tanh %205 : vector<1x32xf32>
    %213 = arith.mulf %211, %212 : vector<1x32xf32>
    %214 = vector.extract_strided_slice %196 {offsets = [0, 64], sizes = [1, 32], strides = [1, 1]} : vector<1x96xf32> to vector<1x32xf32>
    %215 = math.tanh %210 : vector<1x32xf32>
    %216 = arith.mulf %214, %215 : vector<1x32xf32>
    %217 = arith.index_cast %c3_i32 : i32 to index
    %c0_69 = arith.constant 0 : index
    %c0_70 = arith.constant 0 : index
    %218 = vector.load %arg21[%217, %c0_69, %c0_70] : memref<7x1x32xf32, #tpu.memory_space<vmem>>, vector<1x1x32xf32>
    %219 = vector.shape_cast %218 : vector<1x1x32xf32> to vector<1x32xf32>
    %220 = vector.shape_cast %213 : vector<1x32xf32> to vector<1x1x32xf32>
    tpu.vector_store %arg21[%217, %c0_69, %c0_70], %220 {strides = array<i32>} : memref<7x1x32xf32, #tpu.memory_space<vmem>>, vector<1x1x32xf32>,
    %221 = arith.index_cast %c3_i32 : i32 to index
    %c0_71 = arith.constant 0 : index
    %c0_72 = arith.constant 0 : index
    %222 = vector.load %arg22[%221, %c0_71, %c0_72] : memref<7x1x32xf32, #tpu.memory_space<vmem>>, vector<1x1x32xf32>
    %223 = vector.shape_cast %222 : vector<1x1x32xf32> to vector<1x32xf32>
    %224 = vector.shape_cast %216 : vector<1x32xf32> to vector<1x1x32xf32>
    tpu.vector_store %arg22[%221, %c0_71, %c0_72], %224 {strides = array<i32>} : memref<7x1x32xf32, #tpu.memory_space<vmem>>, vector<1x1x32xf32>,
    %c4_i32 = arith.constant 4 : i32
    %225 = arith.index_cast %c4_i32 : i32 to index
    %c0_73 = arith.constant 0 : index
    %c0_74 = arith.constant 0 : index
    %226 = vector.load %arg19[%225, %c0_73, %c0_74] : memref<7x1x128xf32, #tpu.memory_space<vmem>>, vector<1x1x128xf32>
    %227 = vector.shape_cast %226 : vector<1x1x128xf32> to vector<1x128xf32>
    %cst_75 = arith.constant dense<0.000000e+00> : vector<1x128xf32>
    %228 = tpu.matmul %213, %22, %cst_75 {dimension_numbers = #tpu.dot_dimension_numbers<[1], [0], [0], [1], [0, 0, 1, 1], [], []>} : vector<1x32xf32>, vector<32x128xf32>, vector<1x128xf32> -> vector<1x128xf32>
    %229 = arith.addf %227, %228 : vector<1x128xf32>
    %230 = arith.index_cast %c4_i32 : i32 to index
    %c0_76 = arith.constant 0 : index
    %c0_77 = arith.constant 0 : index
    %231 = vector.load %arg20[%230, %c0_76, %c0_77] : memref<7x1x128xf32, #tpu.memory_space<vmem>>, vector<1x1x128xf32>
    %232 = vector.shape_cast %231 : vector<1x1x128xf32> to vector<1x128xf32>
    %cst_78 = arith.constant dense<0.000000e+00> : vector<1x128xf32>
    %233 = tpu.matmul %216, %23, %cst_78 {dimension_numbers = #tpu.dot_dimension_numbers<[1], [0], [0], [1], [0, 0, 1, 1], [], []>} : vector<1x32xf32>, vector<32x128xf32>, vector<1x128xf32> -> vector<1x128xf32>
    %234 = arith.addf %232, %233 : vector<1x128xf32>
    %235 = vector.extract_strided_slice %229 {offsets = [0, 0], sizes = [1, 96], strides = [1, 1]} : vector<1x128xf32> to vector<1x96xf32>
    %236 = arith.negf %235 : vector<1x96xf32>
    %237 = math.exp %236 : vector<1x96xf32>
    %cst_79 = arith.constant 1.000000e+00 : f32
    %238 = vector.broadcast %cst_79 : f32 to vector<1x96xf32>
    %239 = arith.addf %238, %237 : vector<1x96xf32>
    %240 = arith.divf %238, %239 : vector<1x96xf32>
    %241 = vector.extract_strided_slice %234 {offsets = [0, 0], sizes = [1, 96], strides = [1, 1]} : vector<1x128xf32> to vector<1x96xf32>
    %242 = arith.negf %241 : vector<1x96xf32>
    %243 = math.exp %242 : vector<1x96xf32>
    %cst_80 = arith.constant 1.000000e+00 : f32
    %244 = vector.broadcast %cst_80 : f32 to vector<1x96xf32>
    %245 = arith.addf %244, %243 : vector<1x96xf32>
    %246 = arith.divf %244, %245 : vector<1x96xf32>
    %247 = vector.extract_strided_slice %229 {offsets = [0, 96], sizes = [1, 32], strides = [1, 1]} : vector<1x128xf32> to vector<1x32xf32>
    %248 = math.tanh %247 : vector<1x32xf32>
    %249 = vector.extract_strided_slice %234 {offsets = [0, 96], sizes = [1, 32], strides = [1, 1]} : vector<1x128xf32> to vector<1x32xf32>
    %250 = math.tanh %249 : vector<1x32xf32>
    %251 = vector.extract_strided_slice %240 {offsets = [0, 32], sizes = [1, 32], strides = [1, 1]} : vector<1x96xf32> to vector<1x32xf32>
    %252 = arith.mulf %251, %205 : vector<1x32xf32>
    %253 = vector.extract_strided_slice %240 {offsets = [0, 0], sizes = [1, 32], strides = [1, 1]} : vector<1x96xf32> to vector<1x32xf32>
    %254 = arith.mulf %253, %248 : vector<1x32xf32>
    %255 = arith.addf %252, %254 : vector<1x32xf32>
    %256 = vector.extract_strided_slice %246 {offsets = [0, 32], sizes = [1, 32], strides = [1, 1]} : vector<1x96xf32> to vector<1x32xf32>
    %257 = arith.mulf %256, %210 : vector<1x32xf32>
    %258 = vector.extract_strided_slice %246 {offsets = [0, 0], sizes = [1, 32], strides = [1, 1]} : vector<1x96xf32> to vector<1x32xf32>
    %259 = arith.mulf %258, %250 : vector<1x32xf32>
    %260 = arith.addf %257, %259 : vector<1x32xf32>
    %261 = vector.extract_strided_slice %240 {offsets = [0, 64], sizes = [1, 32], strides = [1, 1]} : vector<1x96xf32> to vector<1x32xf32>
    %262 = math.tanh %255 : vector<1x32xf32>
    %263 = arith.mulf %261, %262 : vector<1x32xf32>
    %264 = vector.extract_strided_slice %246 {offsets = [0, 64], sizes = [1, 32], strides = [1, 1]} : vector<1x96xf32> to vector<1x32xf32>
    %265 = math.tanh %260 : vector<1x32xf32>
    %266 = arith.mulf %264, %265 : vector<1x32xf32>
    %267 = arith.index_cast %c4_i32 : i32 to index
    %c0_81 = arith.constant 0 : index
    %c0_82 = arith.constant 0 : index
    %268 = vector.load %arg21[%267, %c0_81, %c0_82] : memref<7x1x32xf32, #tpu.memory_space<vmem>>, vector<1x1x32xf32>
    %269 = vector.shape_cast %268 : vector<1x1x32xf32> to vector<1x32xf32>
    %270 = vector.shape_cast %263 : vector<1x32xf32> to vector<1x1x32xf32>
    tpu.vector_store %arg21[%267, %c0_81, %c0_82], %270 {strides = array<i32>} : memref<7x1x32xf32, #tpu.memory_space<vmem>>, vector<1x1x32xf32>,
    %271 = arith.index_cast %c4_i32 : i32 to index
    %c0_83 = arith.constant 0 : index
    %c0_84 = arith.constant 0 : index
    %272 = vector.load %arg22[%271, %c0_83, %c0_84] : memref<7x1x32xf32, #tpu.memory_space<vmem>>, vector<1x1x32xf32>
    %273 = vector.shape_cast %272 : vector<1x1x32xf32> to vector<1x32xf32>
    %274 = vector.shape_cast %266 : vector<1x32xf32> to vector<1x1x32xf32>
    tpu.vector_store %arg22[%271, %c0_83, %c0_84], %274 {strides = array<i32>} : memref<7x1x32xf32, #tpu.memory_space<vmem>>, vector<1x1x32xf32>,
    %c5_i32 = arith.constant 5 : i32
    %275 = arith.index_cast %c5_i32 : i32 to index
    %c0_85 = arith.constant 0 : index
    %c0_86 = arith.constant 0 : index
    %276 = vector.load %arg19[%275, %c0_85, %c0_86] : memref<7x1x128xf32, #tpu.memory_space<vmem>>, vector<1x1x128xf32>
    %277 = vector.shape_cast %276 : vector<1x1x128xf32> to vector<1x128xf32>
    %cst_87 = arith.constant dense<0.000000e+00> : vector<1x128xf32>
    %278 = tpu.matmul %263, %22, %cst_87 {dimension_numbers = #tpu.dot_dimension_numbers<[1], [0], [0], [1], [0, 0, 1, 1], [], []>} : vector<1x32xf32>, vector<32x128xf32>, vector<1x128xf32> -> vector<1x128xf32>
    %279 = arith.addf %277, %278 : vector<1x128xf32>
    %280 = arith.index_cast %c5_i32 : i32 to index
    %c0_88 = arith.constant 0 : index
    %c0_89 = arith.constant 0 : index
    %281 = vector.load %arg20[%280, %c0_88, %c0_89] : memref<7x1x128xf32, #tpu.memory_space<vmem>>, vector<1x1x128xf32>
    %282 = vector.shape_cast %281 : vector<1x1x128xf32> to vector<1x128xf32>
    %cst_90 = arith.constant dense<0.000000e+00> : vector<1x128xf32>
    %283 = tpu.matmul %266, %23, %cst_90 {dimension_numbers = #tpu.dot_dimension_numbers<[1], [0], [0], [1], [0, 0, 1, 1], [], []>} : vector<1x32xf32>, vector<32x128xf32>, vector<1x128xf32> -> vector<1x128xf32>
    %284 = arith.addf %282, %283 : vector<1x128xf32>
    %285 = vector.extract_strided_slice %279 {offsets = [0, 0], sizes = [1, 96], strides = [1, 1]} : vector<1x128xf32> to vector<1x96xf32>
    %286 = arith.negf %285 : vector<1x96xf32>
    %287 = math.exp %286 : vector<1x96xf32>
    %cst_91 = arith.constant 1.000000e+00 : f32
    %288 = vector.broadcast %cst_91 : f32 to vector<1x96xf32>
    %289 = arith.addf %288, %287 : vector<1x96xf32>
    %290 = arith.divf %288, %289 : vector<1x96xf32>
    %291 = vector.extract_strided_slice %284 {offsets = [0, 0], sizes = [1, 96], strides = [1, 1]} : vector<1x128xf32> to vector<1x96xf32>
    %292 = arith.negf %291 : vector<1x96xf32>
    %293 = math.exp %292 : vector<1x96xf32>
    %cst_92 = arith.constant 1.000000e+00 : f32
    %294 = vector.broadcast %cst_92 : f32 to vector<1x96xf32>
    %295 = arith.addf %294, %293 : vector<1x96xf32>
    %296 = arith.divf %294, %295 : vector<1x96xf32>
    %297 = vector.extract_strided_slice %279 {offsets = [0, 96], sizes = [1, 32], strides = [1, 1]} : vector<1x128xf32> to vector<1x32xf32>
    %298 = math.tanh %297 : vector<1x32xf32>
    %299 = vector.extract_strided_slice %284 {offsets = [0, 96], sizes = [1, 32], strides = [1, 1]} : vector<1x128xf32> to vector<1x32xf32>
    %300 = math.tanh %299 : vector<1x32xf32>
    %301 = vector.extract_strided_slice %290 {offsets = [0, 32], sizes = [1, 32], strides = [1, 1]} : vector<1x96xf32> to vector<1x32xf32>
    %302 = arith.mulf %301, %255 : vector<1x32xf32>
    %303 = vector.extract_strided_slice %290 {offsets = [0, 0], sizes = [1, 32], strides = [1, 1]} : vector<1x96xf32> to vector<1x32xf32>
    %304 = arith.mulf %303, %298 : vector<1x32xf32>
    %305 = arith.addf %302, %304 : vector<1x32xf32>
    %306 = vector.extract_strided_slice %296 {offsets = [0, 32], sizes = [1, 32], strides = [1, 1]} : vector<1x96xf32> to vector<1x32xf32>
    %307 = arith.mulf %306, %260 : vector<1x32xf32>
    %308 = vector.extract_strided_slice %296 {offsets = [0, 0], sizes = [1, 32], strides = [1, 1]} : vector<1x96xf32> to vector<1x32xf32>
    %309 = arith.mulf %308, %300 : vector<1x32xf32>
    %310 = arith.addf %307, %309 : vector<1x32xf32>
    %311 = vector.extract_strided_slice %290 {offsets = [0, 64], sizes = [1, 32], strides = [1, 1]} : vector<1x96xf32> to vector<1x32xf32>
    %312 = math.tanh %305 : vector<1x32xf32>
    %313 = arith.mulf %311, %312 : vector<1x32xf32>
    %314 = vector.extract_strided_slice %296 {offsets = [0, 64], sizes = [1, 32], strides = [1, 1]} : vector<1x96xf32> to vector<1x32xf32>
    %315 = math.tanh %310 : vector<1x32xf32>
    %316 = arith.mulf %314, %315 : vector<1x32xf32>
    %317 = arith.index_cast %c5_i32 : i32 to index
    %c0_93 = arith.constant 0 : index
    %c0_94 = arith.constant 0 : index
    %318 = vector.load %arg21[%317, %c0_93, %c0_94] : memref<7x1x32xf32, #tpu.memory_space<vmem>>, vector<1x1x32xf32>
    %319 = vector.shape_cast %318 : vector<1x1x32xf32> to vector<1x32xf32>
    %320 = vector.shape_cast %313 : vector<1x32xf32> to vector<1x1x32xf32>
    tpu.vector_store %arg21[%317, %c0_93, %c0_94], %320 {strides = array<i32>} : memref<7x1x32xf32, #tpu.memory_space<vmem>>, vector<1x1x32xf32>,
    %321 = arith.index_cast %c5_i32 : i32 to index
    %c0_95 = arith.constant 0 : index
    %c0_96 = arith.constant 0 : index
    %322 = vector.load %arg22[%321, %c0_95, %c0_96] : memref<7x1x32xf32, #tpu.memory_space<vmem>>, vector<1x1x32xf32>
    %323 = vector.shape_cast %322 : vector<1x1x32xf32> to vector<1x32xf32>
    %324 = vector.shape_cast %316 : vector<1x32xf32> to vector<1x1x32xf32>
    tpu.vector_store %arg22[%321, %c0_95, %c0_96], %324 {strides = array<i32>} : memref<7x1x32xf32, #tpu.memory_space<vmem>>, vector<1x1x32xf32>,
    %c6_i32 = arith.constant 6 : i32
    %325 = arith.index_cast %c6_i32 : i32 to index
    %c0_97 = arith.constant 0 : index
    %c0_98 = arith.constant 0 : index
    %326 = vector.load %arg19[%325, %c0_97, %c0_98] : memref<7x1x128xf32, #tpu.memory_space<vmem>>, vector<1x1x128xf32>
    %327 = vector.shape_cast %326 : vector<1x1x128xf32> to vector<1x128xf32>
    %cst_99 = arith.constant dense<0.000000e+00> : vector<1x128xf32>
    %328 = tpu.matmul %313, %22, %cst_99 {dimension_numbers = #tpu.dot_dimension_numbers<[1], [0], [0], [1], [0, 0, 1, 1], [], []>} : vector<1x32xf32>, vector<32x128xf32>, vector<1x128xf32> -> vector<1x128xf32>
    %329 = arith.addf %327, %328 : vector<1x128xf32>
    %330 = arith.index_cast %c6_i32 : i32 to index
    %c0_100 = arith.constant 0 : index
    %c0_101 = arith.constant 0 : index
    %331 = vector.load %arg20[%330, %c0_100, %c0_101] : memref<7x1x128xf32, #tpu.memory_space<vmem>>, vector<1x1x128xf32>
    %332 = vector.shape_cast %331 : vector<1x1x128xf32> to vector<1x128xf32>
    %cst_102 = arith.constant dense<0.000000e+00> : vector<1x128xf32>
    %333 = tpu.matmul %316, %23, %cst_102 {dimension_numbers = #tpu.dot_dimension_numbers<[1], [0], [0], [1], [0, 0, 1, 1], [], []>} : vector<1x32xf32>, vector<32x128xf32>, vector<1x128xf32> -> vector<1x128xf32>
    %334 = arith.addf %332, %333 : vector<1x128xf32>
    %335 = vector.extract_strided_slice %329 {offsets = [0, 0], sizes = [1, 96], strides = [1, 1]} : vector<1x128xf32> to vector<1x96xf32>
    %336 = arith.negf %335 : vector<1x96xf32>
    %337 = math.exp %336 : vector<1x96xf32>
    %cst_103 = arith.constant 1.000000e+00 : f32
    %338 = vector.broadcast %cst_103 : f32 to vector<1x96xf32>
    %339 = arith.addf %338, %337 : vector<1x96xf32>
    %340 = arith.divf %338, %339 : vector<1x96xf32>
    %341 = vector.extract_strided_slice %334 {offsets = [0, 0], sizes = [1, 96], strides = [1, 1]} : vector<1x128xf32> to vector<1x96xf32>
    %342 = arith.negf %341 : vector<1x96xf32>
    %343 = math.exp %342 : vector<1x96xf32>
    %cst_104 = arith.constant 1.000000e+00 : f32
    %344 = vector.broadcast %cst_104 : f32 to vector<1x96xf32>
    %345 = arith.addf %344, %343 : vector<1x96xf32>
    %346 = arith.divf %344, %345 : vector<1x96xf32>
    %347 = vector.extract_strided_slice %329 {offsets = [0, 96], sizes = [1, 32], strides = [1, 1]} : vector<1x128xf32> to vector<1x32xf32>
    %348 = math.tanh %347 : vector<1x32xf32>
    %349 = vector.extract_strided_slice %334 {offsets = [0, 96], sizes = [1, 32], strides = [1, 1]} : vector<1x128xf32> to vector<1x32xf32>
    %350 = math.tanh %349 : vector<1x32xf32>
    %351 = vector.extract_strided_slice %340 {offsets = [0, 32], sizes = [1, 32], strides = [1, 1]} : vector<1x96xf32> to vector<1x32xf32>
    %352 = arith.mulf %351, %305 : vector<1x32xf32>
    %353 = vector.extract_strided_slice %340 {offsets = [0, 0], sizes = [1, 32], strides = [1, 1]} : vector<1x96xf32> to vector<1x32xf32>
    %354 = arith.mulf %353, %348 : vector<1x32xf32>
    %355 = arith.addf %352, %354 : vector<1x32xf32>
    %356 = vector.extract_strided_slice %346 {offsets = [0, 32], sizes = [1, 32], strides = [1, 1]} : vector<1x96xf32> to vector<1x32xf32>
    %357 = arith.mulf %356, %310 : vector<1x32xf32>
    %358 = vector.extract_strided_slice %346 {offsets = [0, 0], sizes = [1, 32], strides = [1, 1]} : vector<1x96xf32> to vector<1x32xf32>
    %359 = arith.mulf %358, %350 : vector<1x32xf32>
    %360 = arith.addf %357, %359 : vector<1x32xf32>
    %361 = vector.extract_strided_slice %340 {offsets = [0, 64], sizes = [1, 32], strides = [1, 1]} : vector<1x96xf32> to vector<1x32xf32>
    %362 = math.tanh %355 : vector<1x32xf32>
    %363 = arith.mulf %361, %362 : vector<1x32xf32>
    %364 = vector.extract_strided_slice %346 {offsets = [0, 64], sizes = [1, 32], strides = [1, 1]} : vector<1x96xf32> to vector<1x32xf32>
    %365 = math.tanh %360 : vector<1x32xf32>
    %366 = arith.mulf %364, %365 : vector<1x32xf32>
    %367 = arith.index_cast %c6_i32 : i32 to index
    %c0_105 = arith.constant 0 : index
    %c0_106 = arith.constant 0 : index
    %368 = vector.load %arg21[%367, %c0_105, %c0_106] : memref<7x1x32xf32, #tpu.memory_space<vmem>>, vector<1x1x32xf32>
    %369 = vector.shape_cast %368 : vector<1x1x32xf32> to vector<1x32xf32>
    %370 = vector.shape_cast %363 : vector<1x32xf32> to vector<1x1x32xf32>
    tpu.vector_store %arg21[%367, %c0_105, %c0_106], %370 {strides = array<i32>} : memref<7x1x32xf32, #tpu.memory_space<vmem>>, vector<1x1x32xf32>,
    %371 = arith.index_cast %c6_i32 : i32 to index
    %c0_107 = arith.constant 0 : index
    %c0_108 = arith.constant 0 : index
    %372 = vector.load %arg22[%371, %c0_107, %c0_108] : memref<7x1x32xf32, #tpu.memory_space<vmem>>, vector<1x1x32xf32>
    %373 = vector.shape_cast %372 : vector<1x1x32xf32> to vector<1x32xf32>
    %374 = vector.shape_cast %366 : vector<1x32xf32> to vector<1x1x32xf32>
    tpu.vector_store %arg22[%371, %c0_107, %c0_108], %374 {strides = array<i32>} : memref<7x1x32xf32, #tpu.memory_space<vmem>>, vector<1x1x32xf32>,
    %c7_i32 = arith.constant 7 : i32
    %c0_109 = arith.constant 0 : index
    %c0_110 = arith.constant 0 : index
    %c0_111 = arith.constant 0 : index
    %375 = vector.load %arg21[%c0_109, %c0_110, %c0_111] : memref<7x1x32xf32, #tpu.memory_space<vmem>>, vector<7x1x32xf32>
    %376 = vector.shape_cast %375 : vector<7x1x32xf32> to vector<7x32xf32>
    %c0_112 = arith.constant 0 : index
    %c0_113 = arith.constant 0 : index
    %377 = vector.load %arg6[%c0_112, %c0_113] : memref<32x32xf32, #tpu.memory_space<vmem>>, vector<32x32xf32>
    %cst_114 = arith.constant dense<0.000000e+00> : vector<7x32xf32>
    %378 = tpu.matmul %376, %377, %cst_114 {dimension_numbers = #tpu.dot_dimension_numbers<[1], [0], [0], [1], [0, 0, 1, 1], [], []>} : vector<7x32xf32>, vector<32x32xf32>, vector<7x32xf32> -> vector<7x32xf32>
    %c0_115 = arith.constant 0 : index
    %c0_116 = arith.constant 0 : index
    %379 = vector.load %arg7[%c0_115, %c0_116] : memref<1x32xf32, #tpu.memory_space<vmem>>, vector<1x32xf32>
    %380 = vector.broadcast %379 : vector<1x32xf32> to vector<7x32xf32>
    %381 = arith.addf %378, %380 : vector<7x32xf32>
    %cst_117 = arith.constant dense<0.000000e+00> : vector<7xf32>
    %382 = vector.multi_reduction <add>, %381, %cst_117 [1] : vector<7x32xf32> to vector<7xf32>
    %383 = vector.shape_cast %382 : vector<7xf32> to vector<7x1xf32>
    %cst_118 = arith.constant 3.200000e+01 : f32
    %384 = vector.broadcast %cst_118 : f32 to vector<7x1xf32>
    %385 = arith.divf %383, %384 : vector<7x1xf32>
    %386 = vector.broadcast %385 : vector<7x1xf32> to vector<7x32xf32>
    %387 = arith.subf %381, %386 : vector<7x32xf32>
    %388 = arith.mulf %387, %387 : vector<7x32xf32>
    %cst_119 = arith.constant dense<0.000000e+00> : vector<7xf32>
    %389 = vector.multi_reduction <add>, %388, %cst_119 [1] : vector<7x32xf32> to vector<7xf32>
    %390 = vector.shape_cast %389 : vector<7xf32> to vector<7x1xf32>
    %cst_120 = arith.constant 3.200000e+01 : f32
    %391 = vector.broadcast %cst_120 : f32 to vector<7x1xf32>
    %392 = arith.divf %390, %391 : vector<7x1xf32>
    %c0_121 = arith.constant 0 : index
    %c0_122 = arith.constant 0 : index
    %393 = vector.load %arg8[%c0_121, %c0_122] : memref<1x32xf32, #tpu.memory_space<vmem>>, vector<1x32xf32>
    %394 = vector.broadcast %385 : vector<7x1xf32> to vector<7x32xf32>
    %395 = arith.subf %381, %394 : vector<7x32xf32>
    %396 = vector.broadcast %393 : vector<1x32xf32> to vector<7x32xf32>
    %397 = arith.mulf %396, %395 : vector<7x32xf32>
    %cst_123 = arith.constant 1.1920929E-7 : f32
    %398 = vector.broadcast %cst_123 : f32 to vector<7x1xf32>
    %399 = arith.addf %392, %398 : vector<7x1xf32>
    %400 = math.rsqrt %399 : vector<7x1xf32>
    %401 = vector.broadcast %400 : vector<7x1xf32> to vector<7x32xf32>
    %402 = arith.mulf %397, %401 : vector<7x32xf32>
    %c0_124 = arith.constant 0 : index
    %c0_125 = arith.constant 0 : index
    %403 = vector.load %arg9[%c0_124, %c0_125] : memref<1x32xf32, #tpu.memory_space<vmem>>, vector<1x32xf32>
    %404 = vector.broadcast %403 : vector<1x32xf32> to vector<7x32xf32>
    %405 = arith.addf %402, %404 : vector<7x32xf32>
    %406 = vector.shape_cast %405 : vector<7x32xf32> to vector<7x1x32xf32>
    %407 = arith.addf %3, %406 : vector<7x1x32xf32>
    %408 = tpu.transpose %407, [1, 0, 2] : vector<7x1x32xf32> -> vector<1x7x32xf32>
    %cst_126 = arith.constant 0.000000e+00 : f32
    %409 = vector.broadcast %cst_126 : f32 to vector<1x1x32xf32>
    %410 = tpu.concatenate %409, %408 in 1 : vector<1x1x32xf32>, vector<1x7x32xf32> -> vector<1x8x32xf32>
    %c0_127 = arith.constant 0 : index
    %c0_128 = arith.constant 0 : index
    %c0_129 = arith.constant 0 : index
    %411 = vector.load %arg17[%c0_127, %c0_128, %c0_129] : memref<1x8x32xf32, #tpu.memory_space<vmem>>, vector<1x8x32xf32>
    tpu.vector_store %arg17[%c0_127, %c0_128, %c0_129], %410 {strides = array<i32>} : memref<1x8x32xf32, #tpu.memory_space<vmem>>, vector<1x8x32xf32>,
    %c0_130 = arith.constant 0 : index
    %c0_131 = arith.constant 0 : index
    %c0_132 = arith.constant 0 : index
    %412 = vector.load %arg22[%c0_130, %c0_131, %c0_132] : memref<7x1x32xf32, #tpu.memory_space<vmem>>, vector<7x1x32xf32>
    %413 = vector.shape_cast %412 : vector<7x1x32xf32> to vector<7x32xf32>
    %c0_133 = arith.constant 0 : index
    %c0_134 = arith.constant 0 : index
    %414 = vector.load %arg13[%c0_133, %c0_134] : memref<32x32xf32, #tpu.memory_space<vmem>>, vector<32x32xf32>
    %cst_135 = arith.constant dense<0.000000e+00> : vector<7x32xf32>
    %415 = tpu.matmul %413, %414, %cst_135 {dimension_numbers = #tpu.dot_dimension_numbers<[1], [0], [0], [1], [0, 0, 1, 1], [], []>} : vector<7x32xf32>, vector<32x32xf32>, vector<7x32xf32> -> vector<7x32xf32>
    %c0_136 = arith.constant 0 : index
    %c0_137 = arith.constant 0 : index
    %416 = vector.load %arg14[%c0_136, %c0_137] : memref<1x32xf32, #tpu.memory_space<vmem>>, vector<1x32xf32>
    %417 = vector.broadcast %416 : vector<1x32xf32> to vector<7x32xf32>
    %418 = arith.addf %415, %417 : vector<7x32xf32>
    %cst_138 = arith.constant dense<0.000000e+00> : vector<7xf32>
    %419 = vector.multi_reduction <add>, %418, %cst_138 [1] : vector<7x32xf32> to vector<7xf32>
    %420 = vector.shape_cast %419 : vector<7xf32> to vector<7x1xf32>
    %cst_139 = arith.constant 3.200000e+01 : f32
    %421 = vector.broadcast %cst_139 : f32 to vector<7x1xf32>
    %422 = arith.divf %420, %421 : vector<7x1xf32>
    %423 = vector.broadcast %422 : vector<7x1xf32> to vector<7x32xf32>
    %424 = arith.subf %418, %423 : vector<7x32xf32>
    %425 = arith.mulf %424, %424 : vector<7x32xf32>
    %cst_140 = arith.constant dense<0.000000e+00> : vector<7xf32>
    %426 = vector.multi_reduction <add>, %425, %cst_140 [1] : vector<7x32xf32> to vector<7xf32>
    %427 = vector.shape_cast %426 : vector<7xf32> to vector<7x1xf32>
    %cst_141 = arith.constant 3.200000e+01 : f32
    %428 = vector.broadcast %cst_141 : f32 to vector<7x1xf32>
    %429 = arith.divf %427, %428 : vector<7x1xf32>
    %c0_142 = arith.constant 0 : index
    %c0_143 = arith.constant 0 : index
    %430 = vector.load %arg15[%c0_142, %c0_143] : memref<1x32xf32, #tpu.memory_space<vmem>>, vector<1x32xf32>
    %431 = vector.broadcast %422 : vector<7x1xf32> to vector<7x32xf32>
    %432 = arith.subf %418, %431 : vector<7x32xf32>
    %433 = vector.broadcast %430 : vector<1x32xf32> to vector<7x32xf32>
    %434 = arith.mulf %433, %432 : vector<7x32xf32>
    %cst_144 = arith.constant 1.1920929E-7 : f32
    %435 = vector.broadcast %cst_144 : f32 to vector<7x1xf32>
    %436 = arith.addf %429, %435 : vector<7x1xf32>
    %437 = math.rsqrt %436 : vector<7x1xf32>
    %438 = vector.broadcast %437 : vector<7x1xf32> to vector<7x32xf32>
    %439 = arith.mulf %434, %438 : vector<7x32xf32>
    %c0_145 = arith.constant 0 : index
    %c0_146 = arith.constant 0 : index
    %440 = vector.load %arg16[%c0_145, %c0_146] : memref<1x32xf32, #tpu.memory_space<vmem>>, vector<1x32xf32>
    %441 = vector.broadcast %440 : vector<1x32xf32> to vector<7x32xf32>
    %442 = arith.addf %439, %441 : vector<7x32xf32>
    %443 = vector.shape_cast %442 : vector<7x32xf32> to vector<7x1x32xf32>
    %444 = arith.addf %5, %443 : vector<7x1x32xf32>
    %445 = tpu.transpose %444, [1, 0, 2] : vector<7x1x32xf32> -> vector<1x7x32xf32>
    %cst_147 = arith.constant 0.000000e+00 : f32
    %446 = vector.broadcast %cst_147 : f32 to vector<1x1x32xf32>
    %447 = tpu.concatenate %446, %445 in 1 : vector<1x1x32xf32>, vector<1x7x32xf32> -> vector<1x8x32xf32>
    %c0_148 = arith.constant 0 : index
    %c0_149 = arith.constant 0 : index
    %c0_150 = arith.constant 0 : index
    %448 = vector.load %arg18[%c0_148, %c0_149, %c0_150] : memref<1x8x32xf32, #tpu.memory_space<vmem>>, vector<1x8x32xf32>
    tpu.vector_store %arg18[%c0_148, %c0_149, %c0_150], %447 {strides = array<i32>} : memref<1x8x32xf32, #tpu.memory_space<vmem>>, vector<1x8x32xf32>,
    return
  }
  func.func @transform_0(%arg0: i32) -> (i32, i32, i32) {
    %c0_i32 = arith.constant 0 : i32
    %c0_i32_0 = arith.constant 0 : i32
    %c0_i32_1 = arith.constant 0 : i32
    return %arg0, %c0_i32, %c0_i32_0 : i32, i32, i32
  }
  func.func @transform_1(%arg0: i32) -> (i32, i32, i32) {
    %c0_i32 = arith.constant 0 : i32
    %c0_i32_0 = arith.constant 0 : i32
    %c0_i32_1 = arith.constant 0 : i32
    return %arg0, %c0_i32, %c0_i32_0 : i32, i32, i32
  }
  func.func @transform_2(%arg0: i32) -> (i32, i32) {
    %c0_i32 = arith.constant 0 : i32
    %c0_i32_0 = arith.constant 0 : i32
    %c0_i32_1 = arith.constant 0 : i32
    return %c0_i32, %c0_i32_0 : i32, i32
  }
  func.func @transform_3(%arg0: i32) -> (i32, i32) {
    %c0_i32 = arith.constant 0 : i32
    %c0_i32_0 = arith.constant 0 : i32
    %c0_i32_1 = arith.constant 0 : i32
    return %c0_i32, %c0_i32_0 : i32, i32
  }
  func.func @transform_4(%arg0: i32) -> (i32, i32) {
    %c0_i32 = arith.constant 0 : i32
    %c0_i32_0 = arith.constant 0 : i32
    %c0_i32_1 = arith.constant 0 : i32
    return %c0_i32, %c0_i32_0 : i32, i32
  }
  func.func @transform_5(%arg0: i32) -> (i32, i32) {
    %c0_i32 = arith.constant 0 : i32
    %c0_i32_0 = arith.constant 0 : i32
    %c0_i32_1 = arith.constant 0 : i32
    return %c0_i32, %c0_i32_0 : i32, i32
  }
  func.func @transform_6(%arg0: i32) -> (i32, i32) {
    %c0_i32 = arith.constant 0 : i32
    %c0_i32_0 = arith.constant 0 : i32
    %c0_i32_1 = arith.constant 0 : i32
    return %c0_i32, %c0_i32_0 : i32, i32
  }
  func.func @transform_7(%arg0: i32) -> (i32, i32) {
    %c0_i32 = arith.constant 0 : i32
    %c0_i32_0 = arith.constant 0 : i32
    %c0_i32_1 = arith.constant 0 : i32
    return %c0_i32, %c0_i32_0 : i32, i32
  }
  func.func @transform_8(%arg0: i32) -> (i32, i32) {
    %c0_i32 = arith.constant 0 : i32
    %c0_i32_0 = arith.constant 0 : i32
    %c0_i32_1 = arith.constant 0 : i32
    return %c0_i32, %c0_i32_0 : i32, i32
  }
  func.func @transform_9(%arg0: i32) -> (i32, i32) {
    %c0_i32 = arith.constant 0 : i32
    %c0_i32_0 = arith.constant 0 : i32
    %c0_i32_1 = arith.constant 0 : i32
    return %c0_i32, %c0_i32_0 : i32, i32
  }
  func.func @transform_10(%arg0: i32) -> (i32, i32) {
    %c0_i32 = arith.constant 0 : i32
    %c0_i32_0 = arith.constant 0 : i32
    %c0_i32_1 = arith.constant 0 : i32
    return %c0_i32, %c0_i32_0 : i32, i32
  }
  func.func @transform_11(%arg0: i32) -> (i32, i32) {
    %c0_i32 = arith.constant 0 : i32
    %c0_i32_0 = arith.constant 0 : i32
    %c0_i32_1 = arith.constant 0 : i32
    return %c0_i32, %c0_i32_0 : i32, i32
  }
  func.func @transform_12(%arg0: i32) -> (i32, i32) {
    %c0_i32 = arith.constant 0 : i32
    %c0_i32_0 = arith.constant 0 : i32
    %c0_i32_1 = arith.constant 0 : i32
    return %c0_i32, %c0_i32_0 : i32, i32
  }
  func.func @transform_13(%arg0: i32) -> (i32, i32) {
    %c0_i32 = arith.constant 0 : i32
    %c0_i32_0 = arith.constant 0 : i32
    %c0_i32_1 = arith.constant 0 : i32
    return %c0_i32, %c0_i32_0 : i32, i32
  }
  func.func @transform_14(%arg0: i32) -> (i32, i32) {
    %c0_i32 = arith.constant 0 : i32
    %c0_i32_0 = arith.constant 0 : i32
    %c0_i32_1 = arith.constant 0 : i32
    return %c0_i32, %c0_i32_0 : i32, i32
  }
  func.func @transform_15(%arg0: i32) -> (i32, i32) {
    %c0_i32 = arith.constant 0 : i32
    %c0_i32_0 = arith.constant 0 : i32
    %c0_i32_1 = arith.constant 0 : i32
    return %c0_i32, %c0_i32_0 : i32, i32
  }
  func.func @transform_16(%arg0: i32) -> (i32, i32, i32) {
    %c0_i32 = arith.constant 0 : i32
    %c0_i32_0 = arith.constant 0 : i32
    %c0_i32_1 = arith.constant 0 : i32
    return %arg0, %c0_i32, %c0_i32_0 : i32, i32, i32
  }
  func.func @transform_17(%arg0: i32) -> (i32, i32, i32) {
    %c0_i32 = arith.constant 0 : i32
    %c0_i32_0 = arith.constant 0 : i32
    %c0_i32_1 = arith.constant 0 : i32
    return %arg0, %c0_i32, %c0_i32_0 : i32, i32, i32
  }
}

</mosaic_0001>

<bundles_post_ra>
// kernel: tpu_custom_call.1
= control target key start
LH: loop header
LB: loop body
LE: loop exit
PB: predicated region body
PF: predicated region fallthrough
CT: control target
= control target key end

     0   :  { %s5326_s0 = inlined_call_operand.hbm [shape: f32[2,8,32], index: 0, kind: input, shape index: {}]   ;;  %s5327_s1 = inlined_call_operand.hbm [shape: f32[2,8,32], index: 1, kind: input, shape index: {}]   ;;  %s5328_s2 = inlined_call_operand.hbm [shape: f32[32,128], index: 2, kind: input, shape index: {}]   ;;  %s5329_s3 = inlined_call_operand.hbm [shape: f32[32,128], index: 3, kind: input, shape index: {}]   ;;  %s5330_s4 = inlined_call_operand.vmem [shape: f32[1,128], index: 4, kind: input, shape index: {}]   ;;  %s5331_s5 = inlined_call_operand.hbm [shape: f32[32,32], index: 5, kind: input, shape index: {}]   ;;  %s5332_s6 = inlined_call_operand.vmem [shape: f32[1,32], index: 6, kind: input, shape index: {}]   ;;  %s5333_s7 = inlined_call_operand.vmem [shape: f32[1,32], index: 7, kind: input, shape index: {}]   ;;  %s5334_s8 = inlined_call_operand.vmem [shape: f32[1,32], index: 8, kind: input, shape index: {}]   ;;  %s5335_s9 = inlined_call_operand.hbm [shape: f32[32,128], index: 9, kind: input, shape index: {}]   ;;  %s5336_s10 = inlined_call_operand.hbm [shape: f32[32,128], index: 10, kind: input, shape index: {}]   ;;  %s5337_s11 = inlined_call_operand.vmem [shape: f32[1,128], index: 11, kind: input, shape index: {}]   ;;  %s5338_s12 = inlined_call_operand.hbm [shape: f32[32,32], index: 12, kind: input, shape index: {}]   ;;  %s5339_s13 = inlined_call_operand.vmem [shape: f32[1,32], index: 13, kind: input, shape index: {}]   ;;  %s5340_s14 = inlined_call_operand.vmem [shape: f32[1,32], index: 14, kind: input, shape index: {}]   ;;  %s5341_s15 = inlined_call_operand.vmem [shape: f32[1,32], index: 15, kind: input, shape index: {}]   ;;  %s5342_s16 = inlined_call_operand.hbm [shape: f32[2,8,32], index: 16, kind: output, shape index: {0}]   ;;  %s5343_s17 = inlined_call_operand.hbm [shape: f32[2,8,32], index: 17, kind: output, shape index: {1}]  }
   0x1   :  { %5359 = sst [smem:[#allocation37_spill]] %s5326_s0 }
   0x2   :  { %5360 = sst [smem:[#allocation38_spill]] %s5327_s1 }
   0x3   :  { %5361 = sst [smem:[#allocation39_spill]] %s5328_s2 }
   0x4   :  { %5362 = sst [smem:[#allocation40_spill]] %s5329_s3 }
   0x5   :  { %5363 = sst [smem:[#allocation41_spill]] %s5331_s5 }
   0x6   :  { %5364 = sst [smem:[#allocation42_spill]] %s5335_s9 }
   0x7   :  { %5365 = sst [smem:[#allocation43_spill]] %s5336_s10 }
   0x8   :  { %5366 = sst [smem:[#allocation44_spill]] %s5338_s12 }
   0x9   :  { %5367 = sst [smem:[#allocation45_spill]] %s5341_s15 }
   0xa   :  { %5368 = sst [smem:[#allocation46_spill]] %s5342_s16 }
   0xb   :  { %5369 = sst [smem:[#allocation47_spill]] %s5343_s17 }
   0xc   :  { %23 = vsyncpa [#allocation7], 0 }
   0xd   :  { %25 = vsyncpa [#allocation7 + $0x1], 0 }
   0xe   :  { %26 = vsyncpa [#allocation10], 0 }
   0xf   :  { %28 = vsyncpa [#allocation10 + $0x1], 0 }
  0x10   :  { %29 = vsyncpa [#allocation13], 0 }
  0x11   :  { %30 = vsyncpa [#allocation16], 0 }
  0x12   :  { %31 = vsyncpa [#allocation19], 0 }
  0x13   :  { %32 = vsyncpa [#allocation8], 0 }
  0x14   :  { %34 = vsyncpa [#allocation8 + $0x1], 0 }
  0x15   :  { %35 = vsyncpa [#allocation22], 0 }
  0x16   :  { %37 = vsyncpa [#allocation22 + $0x1], 0  ;;  %s4478_s24 = smov 0   ;;  %s4480_s25 = smov 0  }
  0x17   :  { %s4482_s26 = smov 0   ;;  %s4484_s27 = smov 0  }
  0x18 LB: > { %5370 = sst [smem:[#allocation31_spill]] %s4355_s24  ;;  %s4369_s28 = smov [#allocation11]   ;;  %s4367_s27 = sphi %s4484_s27, %s5412_s27   ;;  %s4363_s26 = sphi %s4482_s26, %s5417_s26   ;;  %s4359_s25 = sphi %s4480_s25, %s5416_s25   ;;  %s4355_s24 = sphi %s4478_s24, %s5415_s24  }
  0x19   : > { %5371 = sst [smem:[#allocation32_spill]] %s4363_s26  ;;  %s458_s29 = sshll.u32 %s4369_s28, 4  ;;  %s459_s29 = int_to_ptr.vmem [resolvable:$true] %s458_s29 }
  0x1a   : > { %s4499_s0 = sadd.s32 4294967295, %s4367_s27   ;;  %p3434_p0 = scmp.ge.s32.totalorder %s4367_s27, 1 }
  0x1b   : > { %p5355_p1 = scmp.eq.s32.totalorder %s4499_s0, 0  ;;  %p446_p2 = scmp.lt.s32.totalorder %s4367_s27, 3 }
  0x1c   : > { %s4370_s18 = smov [#allocation12]   ;;  %s4371_s20 = smov [#allocation15]  }
  0x1d   : > { %p4504_p3 = pnand %p3434_p0, %p446_p2  ;;  %s471_s19 = sshll.u32 %s4370_s18, 4  ;;  %s4517_s19 = int_to_ptr.vmem [resolvable:$true] %s471_s19 }
  0x1e   : > { %s509_s21 = sshll.u32 %s4371_s20, 4  ;;  %s4052_s23 = scalar_lea.vmem %s459_s29, 512  ;;  %s4519_s21 = int_to_ptr.vmem [resolvable:$true] %s509_s21 }
  0x1f   : > { %s5372_s30 = scalar_select %p4504_p3, 1, 0 }
  0x20   : > { %p3831_p5 = pneg %p4504_p3  ;;  %p4053_p8 = scmp.ne.s32.totalorder %s459_s29, %s4052_s23 }
  0x21   : > { %p4060_p11 = scmp.lt.s32.totalorder %s459_s29, %s459_s29  ;;  %p4061_p12 = scmp.lt.s32.totalorder %s4052_s23, %s4052_s23 }
  0x22   : > { %p4513_p6 = pnand %p3831_p5, %p5355_p1 }
  0x23   : > { %p4062_p13 = por %p4061_p12, %p4060_p11 }
  0x24   : > { %p4523_p7 = pneg %p4513_p6 }
  0x26   : > { %p4055_p9 = pnand %p4053_p8, %p4523_p7 }
  0x28   : > { %p4056_p10 = pneg %p4055_p9 }
  0x2a   : > { %p4063_p0 = pnand %p4062_p13, %p4056_p10 }
  0x2c   : > { %4066 = shalt.err (!%p4063_p0)
}
  0x2d   : > { %s4372_s28 = smov 128   ;;  %s4373_s18 = smov 8  }
  0x2e   : > { %s5375_s2 = sld [smem:[#allocation39_spill]]  ;;  %s4078_s16 = scalar_lea.vmem %s4517_s19, 512 }
  0x2f   : > { %p4079_p2 = scmp.ne.s32.totalorder %s4517_s19, %s4078_s16  ;;  %p4086_p9 = scmp.lt.s32.totalorder %s4517_s19, %s4517_s19 }
  0x30   : > { %p4087_p10 = scmp.lt.s32.totalorder %s4078_s16, %s4078_s16 }
  0x31   : > { %p4081_p5 = pnand %p4079_p2, %p4523_p7 }
  0x32   : > { %p4088_p11 = por %p4087_p10, %p4086_p9 }
  0x33   : > { %p4082_p8 = pneg %p4081_p5 }
  0x34   : > { %3834 = dma.hbm_to_vmem [thread:$0]  (!%p4513_p6), %s5375_s2, 512, %s459_s29, [#allocation10], %s4372_s28, %s4372_s28, %s4373_s18  }
  0x35   : > { %p4089_p12 = pnand %p4088_p11, %p4082_p8 }
  0x37   : > { %4092 = shalt.err (!%p4089_p12)
}
  0x38   : > { %s5376_s3 = sld [smem:[#allocation40_spill]]  ;;  %s4104_s29 = scalar_lea.vmem %s4519_s21, 512 }
  0x39   : > { %p4105_p13 = scmp.ne.s32.totalorder %s4519_s21, %s4104_s29  ;;  %p4112_p5 = scmp.lt.s32.totalorder %s4519_s21, %s4519_s21 }
  0x3a   : > { %p4113_p8 = scmp.lt.s32.totalorder %s4104_s29, %s4104_s29 }
  0x3b   : > { %p4107_p0 = pnand %p4105_p13, %p4523_p7 }
  0x3c   : > { %p4114_p9 = por %p4113_p8, %p4112_p5 }
  0x3d   : > { %p4108_p2 = pneg %p4107_p0 }
  0x3e   : > { %3837 = dma.hbm_to_vmem [thread:$0]  (!%p4513_p6), %s5376_s3, 512, %s4517_s19, [#allocation13], %s4372_s28, %s4372_s28, %s4373_s18  }
  0x3f   : > { %p4115_p10 = pnand %p4114_p9, %p4108_p2 }
  0x41   : > { %4118 = shalt.err (!%p4115_p10)
}
  0x42   : > { %s5377_s9 = sld [smem:[#allocation42_spill]]  ;;  %s4374_s19 = smov [#allocation14]  }
  0x43   : > { %s487_s23 = sshll.u32 %s4374_s19, 4  ;;  %s4375_s17 = smov [#allocation17]   ;;  %s488_s23 = int_to_ptr.vmem [resolvable:$true] %s487_s23 }
  0x44   : > { %s522_s2 = sshll.u32 %s4375_s17, 4  ;;  %s4130_s29 = scalar_lea.vmem %s488_s23, 512  ;;  %s523_s2 = int_to_ptr.vmem [resolvable:$true] %s522_s2 }
  0x45   : > { %p4131_p11 = scmp.ne.s32.totalorder %s488_s23, %s4130_s29  ;;  %p4138_p0 = scmp.lt.s32.totalorder %s488_s23, %s488_s23 }
  0x46   : > { %p4139_p2 = scmp.lt.s32.totalorder %s4130_s29, %s4130_s29 }
  0x47   : > { %p4133_p12 = pnand %p4131_p11, %p4523_p7 }
  0x48   : > { %3843 = dma.hbm_to_vmem [thread:$0]  (!%p4513_p6), %s5377_s9, 512, %s4519_s21, [#allocation16], %s4372_s28, %s4372_s28, %s4373_s18  }
  0x49   : > { %p4134_p13 = pneg %p4133_p12  ;;  %p4140_p5 = por %p4139_p2, %p4138_p0 }
  0x4b   : > { %p4141_p8 = pnand %p4140_p5, %p4134_p13 }
  0x4d   : > { %4144 = shalt.err (!%p4141_p8)
}
  0x4e   : > { %s5378_s5 = sld [smem:[#allocation41_spill]]  ;;  %s4156_s20 = scalar_lea.vmem %s523_s2, 512 }
  0x4f   : > { %p4157_p9 = scmp.ne.s32.totalorder %s523_s2, %s4156_s20  ;;  %p4164_p12 = scmp.lt.s32.totalorder %s523_s2, %s523_s2 }
  0x50   : > { %p4165_p0 = scmp.lt.s32.totalorder %s4156_s20, %s4156_s20 }
  0x51   : > { %p4159_p10 = pnand %p4157_p9, %p4523_p7 }
  0x52   : > { %p4166_p13 = por %p4165_p0, %p4164_p12 }
  0x53   : > { %p4160_p11 = pneg %p4159_p10 }
  0x54   : > { %3840 = dma.hbm_to_vmem [thread:$0]  (!%p4513_p6), %s5378_s5, 512, %s488_s23, [#allocation13], %s4372_s28, %s4372_s28, %s4373_s18  }
  0x55   : > { %p4167_p2 = pnand %p4166_p13, %p4160_p11 }
  0x57   : > { %4170 = shalt.err (!%p4167_p2)
}
  0x58   : > { %s5379_s10 = sld [smem:[#allocation43_spill]]  ;;  %s4376_s23 = smov [#allocation18]  }
  0x59   : > { %s538_s29 = sshll.u32 %s4376_s23, 4  ;;  %s539_s29 = int_to_ptr.vmem [resolvable:$true] %s538_s29 }
  0x5a   : > { %s4182_s21 = scalar_lea.vmem %s539_s29, 512  ;;  %p4190_p10 = scmp.lt.s32.totalorder %s539_s29, %s539_s29 }
  0x5b   : > { %p4183_p5 = scmp.ne.s32.totalorder %s539_s29, %s4182_s21  ;;  %p4191_p11 = scmp.lt.s32.totalorder %s4182_s21, %s4182_s21 }
  0x5d   : > { %p4185_p8 = pnand %p4183_p5, %p4523_p7  ;;  %p4192_p12 = por %p4191_p11, %p4190_p10 }
  0x5e   : > { %3846 = dma.hbm_to_vmem [thread:$0]  (!%p4513_p6), %s5379_s10, 512, %s523_s2, [#allocation16], %s4372_s28, %s4372_s28, %s4373_s18  }
  0x5f   : > { %p4186_p9 = pneg %p4185_p8 }
  0x61   : > { %p4193_p0 = pnand %p4192_p12, %p4186_p9 }
  0x63   : > { %4196 = shalt.err (!%p4193_p0)
}
  0x64   : > { %s5380_s12 = sld [smem:[#allocation44_spill]]  ;;  %s3433_s1 = sadd.s32 4294967294, %s4367_s27  }
  0x65   : > { %s4599_s22 = sadd.s32 1, %s4367_s27   ;;  %s50_s19 = sadd.s32 1, %s4363_s26 }
  0x66   : > { %5381 = sst [smem:[#allocation33_spill]] %s4599_s22  ;;  %s47_s20 = ssub.s32 %s4367_s27, %s4599_s22 }
  0x67   : > { %p48_p7 = scmp.eq.s32.totalorder %s47_s20, 0  ;;  %p57_p13 = scmp.ne.s32.totalorder %s4363_s26, %s4359_s25 }
  0x68   : > { %p58_p2 = scmp.eq.s32.totalorder %s4367_s27, 0  ;;  %p63_p5 = scmp.ne.s32.totalorder %s4359_s25, %s4355_s24 }
  0x69   : > { %s4610_s17 = scalar_select %p48_p7, %s4363_s26, %s50_s19  }
  0x6a   : > { %3849 = dma.hbm_to_vmem [thread:$0]  (!%p4513_p6), %s5380_s12, 512, %s539_s29, [#allocation19], %s4372_s28, %s4372_s28, %s4373_s18  }
  0x6b   : > { %5382 = sst [smem:[#allocation34_spill]] %s4610_s17  ;;  %p4612_p8 = por %p58_p2, %p57_p13 }
  0x6c   : > { %p4618_p6 = por %p5355_p1, %p63_p5  ;;  %p407_p9 = scmp.eq.s32.totalorder %s4499_s0, 1 }
  0x6d   : > { %p413_p10 = scmp.eq.s32.totalorder %s3433_s1, 1  ;;  %p3870_p11 = scmp.lt.s32.totalorder %s4367_s27, 2 }
  0x6e   : > { %s5384_s28 = scalar_select %p4618_p6, 1, 0 }
  0x6f   : > { %s561_s18 = sand.u32 1, %s4363_s26   ;;  %p4625_p12 = por %p407_p9, %p57_p13 }
  0x70   : > { %p4629_p0 = por %p413_p10, %p63_p5  ;;  %s4633_s16 = sshll.u32 %s561_s18, 3 }
  0x71   : > { %s5385_s29 = scalar_select %p4625_p12, 1, 0 }
  0x72   : > { %s5387_s21 = scalar_select %p4629_p0, 1, 0 }
  0x73   : > { %5386 = sst [smem:[#allocation35_spill]] %s5385_s29  ;;  %s3443_s2 = sshll.u32 %s4367_s27, 7 }
  0x74   : > { %5388 = sst [smem:[#allocation36_spill]] %s5387_s21  ;;  %s565_s1 = scalar_lea.vmem [#allocation6], %s4633_s16 }
  0x75   : > { %s5389_s3 = sld [smem:[#allocation37_spill]]  ;;  %s572_s9 = sshll.u32 %s565_s1, 4  ;;  %s4642_s9 = int_to_ptr.vmem [resolvable:$true] %s572_s9 }
  0x76   : > { %p4646_p7 = pnand %p3870_p11, %p4612_p8  ;;  %s5391_s26 = sld [smem:[#allocation38_spill]] }
  0x77   : > { %s579_s19 = sand.u32 1, %s4367_s27   ;;  %s562_s21 = scalar_lea.sflag [#allocation7], %s561_s18 }
  0x78   : > { %p4199_p2 = pneg %p4646_p7 }
  0x7b   : > { %s4639_s5 = scalar_lea.hbm %s5389_s3, %s3443_s2  ;;  %s4202_s29 = scalar_lea.hbm %s5389_s3, 256 }
  0x7c   : > { %s5392_s22 = smov %s5391_s26  ;;  %s4653_s20 = scalar_lea.hbm %s5391_s26, %s3443_s2 }
  0x7d   : > { %s4197_s24 = scalar_lea.hbm %s4639_s5, 128  ;;  %p4203_p9 = scmp.lt.s32.totalorder %s4639_s5, %s5389_s3 }
  0x7e   : > { %p4198_p13 = scmp.ne.s32.totalorder %s4639_s5, %s4197_s24  ;;  %p4204_p10 = scmp.lt.s32.totalorder %s4202_s29, %s4197_s24 }
  0x80   : > { %p4200_p5 = pnand %p4199_p2, %p4198_p13  ;;  %p4205_p11 = por %p4204_p10, %p4203_p9 }
  0x82   : > { %p4201_p8 = pneg %p4200_p5 }
  0x84   : > { %p4206_p4 = pnand %p4205_p11, %p4201_p8 }
  0x86   : > { %4209 = shalt.err (!%p4206_p4)
}
  0x87   : > { %s4210_s26 = scalar_lea.vmem %s4642_s9, 128  ;;  %s4377_s17 = smov [#allocation6]  }
  0x88   : > { %p4211_p1 = scmp.ne.s32.totalorder %s4642_s9, %s4210_s26  ;;  %s4215_s18 = sshll.u32 %s4377_s17, 4  ;;  %s4216_s18 = int_to_ptr.vmem [resolvable:$false] %s4215_s18 }
  0x89   : > { %s4217_s2 = scalar_lea.vmem %s4216_s18, 256  ;;  %p4218_p0 = scmp.lt.s32.totalorder %s4642_s9, %s4216_s18 }
  0x8a   : > { %p4213_p13 = pnand %p4211_p1, %p4199_p2  ;;  %p4219_p12 = scmp.lt.s32.totalorder %s4217_s2, %s4210_s26 }
  0x8c   : > { %p4214_p5 = pneg %p4213_p13  ;;  %p4220_p6 = por %p4219_p12, %p4218_p0 }
  0x8e   : > { %p4221_p9 = pnand %p4220_p6, %p4214_p5 }
  0x90   : > { %4224 = shalt.err (!%p4221_p9)
}
  0x91   : > { %3853 = dma.hbm_to_vmem [thread:$0]  (!%p4646_p7), %s4639_s5, 128, %s4642_s9, %s562_s21  }
  0x92   : > { %s583_s15 = scalar_lea.vmem [#allocation9], %s4633_s16  ;;  %s580_s29 = scalar_lea.sflag [#allocation10], %s579_s19 }
  0x93   : > { %s590_s24 = sshll.u32 %s583_s15, 4  ;;  %s4225_s23 = scalar_lea.hbm %s4653_s20, 128  ;;  %s591_s24 = int_to_ptr.vmem [resolvable:$true] %s590_s24 }
  0x94   : > { %p4226_p1 = scmp.ne.s32.totalorder %s4653_s20, %s4225_s23  ;;  %s4230_s26 = scalar_lea.hbm %s5392_s22, 256 }
  0x95   : > { %p4231_p12 = scmp.lt.s32.totalorder %s4653_s20, %s5392_s22  ;;  %p4232_p0 = scmp.lt.s32.totalorder %s4230_s26, %s4225_s23 }
  0x96   : > { %p4228_p4 = pnand %p4226_p1, %p4199_p2 }
  0x97   : > { %p4233_p8 = por %p4232_p0, %p4231_p12 }
  0x98   : > { %p4229_p6 = pneg %p4228_p4 }
  0x9a   : > { %p4234_p10 = pnand %p4233_p8, %p4229_p6 }
  0x9c   : > { %4237 = shalt.err (!%p4234_p10)
}
  0x9d   : > { %s4238_s5 = scalar_lea.vmem %s591_s24, 128  ;;  %s4378_s9 = smov [#allocation9]  }
  0x9e   : > { %p4239_p11 = scmp.ne.s32.totalorder %s591_s24, %s4238_s5  ;;  %s4243_s21 = sshll.u32 %s4378_s9, 4  ;;  %s4244_s21 = int_to_ptr.vmem [resolvable:$false] %s4243_s21 }
  0x9f   : > { %s4245_s16 = scalar_lea.vmem %s4244_s21, 256  ;;  %p4246_p9 = scmp.lt.s32.totalorder %s591_s24, %s4244_s21 }
  0xa0   : > { %p4241_p13 = pnand %p4239_p11, %p4199_p2  ;;  %p4247_p1 = scmp.lt.s32.totalorder %s4245_s16, %s4238_s5 }
  0xa2   : > { %p4242_p5 = pneg %p4241_p13  ;;  %p4248_p4 = por %p4247_p1, %p4246_p9 }
  0xa4   : > { %p4249_p3 = pnand %p4248_p4, %p4242_p5 }
  0xa6   : > { %4252 = shalt.err (!%p4249_p3)
}
  0xa7   : > { %3856 = dma.hbm_to_vmem [thread:$0]  (!%p4646_p7), %s4653_s20, 128, %s591_s24, %s580_s29  }
  0xa8   : > { %p5393_p6 = scmp.ne.s32.totalorder %s5372_s30, 0 }
  0xa9   : > { %s4704_s19 = sand.u32 (!%p5393_p6), 1, %s4359_s25   ;;  %p5394_p2 = scmp.ne.s32.totalorder (!%p5393_p6), %s5384_s28, 0 }
  0xaa   : > { %599 = sbr.rel (%p5393_p6) target bundleno = 5638 (0x1606), region = 84  ;;  %s4707_s2 = sshll.u32 (!%p5393_p6), %s4704_s19, 3 }
  0xab   : > { %s602_s15 = scalar_lea.sflag (!%p5393_p6), [#allocation7], %s4704_s19  ;;  %s605_s23 = scalar_lea.vmem (!%p5393_p6), [#allocation6], %s4707_s2 }
  0xaf   : > { %4322 = dma.done.wait (%p5394_p2), %s602_s15, 128  }
  0xb0   : > { %4324 = vsyncadd (%p5394_p2), %s602_s15, 4294967168  ;;  %s610_s10 = sand.u32 1, %s4499_s0   ;;  %s614_s20 = scalar_lea.vmem [#allocation9], %s4707_s2 }
  0xb1   : > { %s611_s30 = scalar_lea.sflag [#allocation10], %s610_s10 }
  0xb2   : > { %4326 = dma.done.wait (%p5394_p2), %s611_s30, 128  }
  0xb3   : > { %4328 = vsyncadd (%p5394_p2), %s611_s30, 4294967168  ;;  %p5395_p3 = scmp.eq.s32.totalorder %s4499_s0, 0 }
  0xb5   : > { %4330 = dma.done.wait (%p5395_p3), [#allocation10], 512   ;;  %p5396_p7 = pmov %p5395_p3 }
  0xb6   : > { %p5397_p12 = pmov %p5395_p3 }
  0xb7   : > { %4332 = vsyncadd (%p5396_p7), [#allocation10], 4294966784 }
  0xb8   : > { %4334 = dma.done.wait (%p5397_p12), [#allocation13], 1024   ;;  %p5398_p0 = pmov %p5395_p3 }
  0xba   : > { %4336 = vsyncadd (%p5398_p0), [#allocation13], 4294966272  ;;  %p5399_p8 = pmov %p5398_p0 }
  0xbb   : > { %p5400_p10 = pmov %p5398_p0 }
  0xbc   : > { %4338 = dma.done.wait (%p5399_p8), [#allocation16], 1024  }
  0xbd   : > { %4340 = vsyncadd (%p5400_p10), [#allocation16], 4294966272  ;;  %p5401_p11 = pmov %p5398_p0 }
  0xbe   : > { %p5402_p13 = pmov %p5398_p0 }
  0xbf   : > { %4342 = dma.done.wait (%p5401_p11), [#allocation19], 512  }
  0xc0   : > { %4344 = vsyncadd (%p5402_p13), [#allocation19], 4294966784  ;;  %v705_v0 = vlaneseq  ;;  %v4379_v1 = vmov 0.0   ;;  %v4380_v2 = vmov 1983009808   ;;  %vm4381_vm0 = vmmov 0  }
  0xc1   : > { %3601 = vmatprep.subr.mxu0 %v4379_v1  ;;  %3612 = vmatprep.subr.mxu1 %v4379_v1  ;;  %v703_v3 = vunpack.c.l.s4 %v4380_v2  ;;  %v4382_v5 = vmov 1934713408   ;;  %v786_v10 = vld [vmem:[#allocation11 + $0x18] sm:$0xff]  ;;  %v785_v11 = vld [vmem:[#allocation11 + $0x10] sm:$0xff]  ;;  %v784_v15 = vld [vmem:[#allocation11 + $0x8] sm:$0xff]  ;;  %vm802_vm1 = vcmask 1041409  }
  0xc2   : > { %3609 = vmatprep.mubr.msk.f32.mxu0 %vm4381_vm0, %v4379_v1  ;;  %v4741_v4 = vshrl.u32 %v705_v0, 7  ;;  %v718_v6 = vunpack.c.l.s4 %v4382_v5  ;;  %3620 = vmatprep.mubr.msk.f32.mxu1 %vm4381_vm0, %v4379_v1  ;;  %v958_v12 = vld [vmem:[#allocation15 + $0x18] sm:$0xff]  ;;  %v957_v13 = vld [vmem:[#allocation15 + $0x10] sm:$0xff]  ;;  %v956_v16 = vld [vmem:[#allocation15 + $0x8] sm:$0xff]  ;;  %vm805_vm2 = vcmask 1042434   ;;  %vm808_vm3 = vcmask 1043459  }
  0xc3   : > { %v704_v7 = vunpack.c.0.s8 %v703_v3  ;;  %3602 = vmatpush3.msra.mxu0 %v786_v10  ;;  %3613 = vmatpush3.msra.mxu1 %v958_v12  ;;  %v699_v17 = vld [vmem:[%s605_s23] sm:$0xff]  ;;  %v700_v20 = vld [vmem:[%s614_s20] sm:$0xff]  ;;  %vm811_vm4 = vcmask 1044484   ;;  %vm814_vm5 = vcmask 1045509   ;;  %vm817_vm6 = vcmask 1046534   ;;  %s4384_s12 = smov 32  }
  0xc4   : > { %v719_v8 = vunpack.c.0.s8 %v718_v6  ;;  %3603 = vmatprep.subr.mxu0 %v4379_v1  ;;  %3614 = vmatprep.subr.mxu1 %v4379_v1  ;;  %v701_v18 = vcombine.high %v699_v17, %v4379_v1  ;;  %v783_v21 = vld [vmem:[#allocation11] sm:$0xff]  ;;  %v742_v22 = vcombine.high %v700_v20, %v4379_v1  ;;  %vm819_vm7 = vcmask 261120   ;;  %v4841_v63 = vld [vmem:[#allocation12 + $0x18] sm:$0xff]  ;;  %v4847_v5 = vld [vmem:[#allocation12 + $0x10] sm:$0xff]  ;;  %s4385_s26 = smov 64   ;;  %s5403_s24 = sld [smem:[#allocation45_spill]] }
  0xc5   : > { %v4746_v9 = vsub.s32 %v704_v7, %v4741_v4  ;;  %3604 = vmatpush3.msra.mxu0 %v785_v11  ;;  %3615 = vmatpush3.msra.mxu1 %v957_v13  ;;  %v955_v27 = vld [vmem:[#allocation15] sm:$0xff]  ;;  %v4849_v6 = vld [vmem:[#allocation17 + $0x18] sm:$0xff]  ;;  %v4859_v10 = vld [vmem:[#allocation17 + $0x10] sm:$0xff]  ;;  %vm1331_vm8 = vcmask 253952   ;;  %vm2795_vm9 = vcmask 260096   ;;  %s3507_s29 = sshll.u32 %s4499_s0, 7 }
  0xc6   : > { %v4749_v14 = vsub.s32 %v719_v8, %v4741_v4  ;;  %3605 = vmatprep.subr.mxu0 %v4379_v1  ;;  %3616 = vmatprep.subr.mxu1 %v4379_v1  ;;  %v4857_v8 = vld [vmem:[#allocation12 + $0x8] sm:$0xff]  ;;  %v4865_v11 = vld [vmem:[#allocation12] sm:$0xff]  ;;  %s691_s1 = scalar_lea.vmem [#allocation20], %s4707_s2  ;;  %vm2933_vm10 = vcmask 1040384   ;;  %s5405_s5 = sld [smem:[#allocation46_spill]] }
  0xc7   : > { %v708_v19 = vrot.slane %v699_v17, %v4746_v9  ;;  %v749_v23 = vrot.slane %v700_v20, %v4746_v9  ;;  %3606 = vmatpush3.msra.mxu0 %v784_v15  ;;  %3617 = vmatpush3.msra.mxu1 %v956_v16  ;;  %v715_v24 = vrot.slane %v701_v18, %v4746_v9  ;;  %v4867_v12 = vld [vmem:[#allocation17 + $0x8] sm:$0xff]  ;;  %v4873_v13 = vld [vmem:[#allocation17] sm:$0xff]  ;;  %v4383_v15 = vmov 1966171168   ;;  %s698_s21 = scalar_lea.vmem [#allocation21], %s4707_s2  ;;  %s3220_s15 = scalar_lea.sflag [#allocation8], %s4704_s19 }
  0xc8   : > { %3607 = vmatprep.subr.mxu0 %v4379_v1  ;;  %3618 = vmatprep.subr.mxu1 %v4379_v1  ;;  %v756_v28 = vrot.slane %v742_v22, %v4746_v9  ;;  %v895_v16 = vunpack.c.l.s4 %v4383_v15  ;;  %v3457_v18 = vld [vmem:[%s5330_s4] ss:$0 sm:$0xff]  ;;  %s3251_s16 = sshll.u32 %s698_s21, 4  ;;  %s4386_s10 = smov [#allocation20]   ;;  %s3252_s16 = int_to_ptr.vmem [resolvable:$true] %s3251_s16 }
  0xc9   : > { %v716_v25 = vcombine.high %v708_v19, %v4379_v1  ;;  %v4766_v26 = vrot.slane %v708_v19, %v4749_v14  ;;  %v757_v29 = vcombine.high %v749_v23, %v4379_v1  ;;  %v4773_v30 = vrot.slane %v749_v23, %v4749_v14  ;;  %3608 = vmatpush3.msra.mxu0 %v783_v21  ;;  %v3463_v21 = vld [vmem:[%s5337_s11] ss:$0 sm:$0xff]  ;;  %s4257_s30 = sshll.u32 %s4386_s10, 4  ;;  %s4258_s30 = int_to_ptr.vmem [resolvable:$false] %s4257_s30 }
  0xca   : > { %v4779_v32 = vrot.slane %v715_v24, %v4749_v14  ;;  %v4786_v34 = vcombine.high %v715_v24, %v4379_v1  ;;  %3619 = vmatpush3.msra.mxu1 %v955_v27  ;;  %v4792_v36 = vrot.slane %v756_v28, %v4749_v14  ;;  %v4799_v38 = vcombine.high %v756_v28, %v4379_v1  ;;  %s4259_s20 = scalar_lea.vmem %s4258_s30, 256 }
  0xcb   : > { %v4776_v31 = vrot.slane %v716_v25, %v4749_v14  ;;  %v4783_v33 = vcombine.high %v4766_v26, %v4379_v1  ;;  %v4789_v35 = vrot.slane %v757_v29, %v4749_v14  ;;  %v4796_v37 = vcombine.high %v4773_v30, %v4379_v1  ;;  %3623 = vmatprep.subr.mxu0 %v4379_v1 }
  0xcc   : > { %v4807_v40 = vcombine.high %v4779_v32, %v4379_v1  ;;  %3634 = vmatprep.subr.mxu1 %v4379_v1  ;;  %v810_v43 = vrot.slane %v4779_v32, 4  ;;  %v816_v44 = vrot.slane %v4786_v34, 2  ;;  %v4821_v46 = vcombine.high %v4792_v36, %v4379_v1  ;;  %s5248_s9 = scalar_lea.hbm %s5405_s5, %s3507_s29 }
  0xcd   : > { %v4803_v39 = vcombine.high %v4776_v31, %v4379_v1  ;;  %v801_v41 = vrot.slane %v4783_v33, 7  ;;  %v804_v42 = vrot.slane %v4776_v31, 6  ;;  %v4817_v45 = vcombine.high %v4789_v35, %v4379_v1 }
  0xce   : > { %v813_v49 = vrot.slane %v4807_v40, 3  ;;  %v973_v50 = vrot.slane %v4796_v37, 7  ;;  %v975_v52 = vrot.slane %v4789_v35, 6  ;;  %v979_v54 = vrot.slane %v4792_v36, 4 }
  0xcf   : > { %v803_v47 = vsel %vm802_vm1, %v801_v41, %v4766_v26  ;;  %v807_v48 = vrot.slane %v4803_v39, 5  ;;  %v977_v53 = vrot.slane %v4817_v45, 5  ;;  %v981_v57 = vrot.slane %v4821_v46, 3 }
  0xd0   : > { %v806_v51 = vsel %vm805_vm2, %v804_v42, %v803_v47  ;;  %v974_v56 = vsel %vm802_vm1, %v973_v50, %v4773_v30  ;;  %v983_v60 = vrot.slane %v4799_v38, 2  ;;  %v896_v17 = vunpack.c.0.s8 %v895_v16 }
  0xd1   : > { %v809_v55 = vsel %vm808_vm3, %v807_v48, %v806_v51  ;;  %v976_v59 = vsel %vm805_vm2, %v975_v52, %v974_v56 }
  0xd2   : > { %v812_v58 = vsel %vm811_vm4, %v810_v43, %v809_v55  ;;  %v978_v62 = vsel %vm808_vm3, %v977_v53, %v976_v59  ;;  %v4909_v19 = vsub.s32 %v896_v17, %v4741_v4 }
  0xd3   : > { %v815_v61 = vsel %vm814_vm5, %v813_v49, %v812_v58  ;;  %v980_v2 = vsel %vm811_vm4, %v979_v54, %v978_v62 }
  0xd4   : > { %v818_v0 = vsel %vm817_vm6, %v816_v44, %v815_v61  ;;  %v982_v3 = vsel %vm814_vm5, %v981_v57, %v980_v2 }
  0xd5   : > { %3610 = vmatmul.mubr.msk.f32.vlgmr.msra.gmra.mxu0 %vm819_vm7, %v818_v0  ;;  %v984_v7 = vsel %vm817_vm6, %v983_v60, %v982_v3 }
  0xd6   : > { %3624 = vmatpush3.msra.mxu0 %v4841_v63  ;;  %3631 = vmatprep.mubr.msk.f32.mxu0 %vm4381_vm0, %v4379_v1 }
  0xd7   : > { %3621 = vmatmul.mubr.msk.f32.vlgmr.msra.gmra.mxu1 %vm819_vm7, %v984_v7  ;;  %3625 = vmatprep.subr.mxu0 %v4379_v1 }
  0xd8   : > { %3626 = vmatpush3.msra.mxu0 %v4847_v5  ;;  %3635 = vmatpush3.msra.mxu1 %v4849_v6 }
  0xd9   : > { %3627 = vmatprep.subr.mxu0 %v4379_v1  ;;  %3636 = vmatprep.subr.mxu1 %v4379_v1 }
  0xda   : > { %3628 = vmatpush3.msra.mxu0 %v4857_v8  ;;  %3637 = vmatpush3.msra.mxu1 %v4859_v10 }
  0xdb   : > { %3629 = vmatprep.subr.mxu0 %v4379_v1  ;;  %3638 = vmatprep.subr.mxu1 %v4379_v1 }
  0xdc   : > { %3630 = vmatpush3.msra.mxu0 %v4865_v11  ;;  %3639 = vmatpush3.msra.mxu1 %v4867_v12 }
  0xdd   : > { %3632 = vmatmul.mubr.f32.vlgmr.msra.gmra.mxu0 %v4379_v1  ;;  %3640 = vmatprep.subr.mxu1 %v4379_v1 }
  0xde   : > { %3641 = vmatpush3.msra.mxu1 %v4873_v13  ;;  %3642 = vmatprep.mubr.msk.f32.mxu1 %vm4381_vm0, %v4379_v1 }
  0xdf   : > { %3643 = vmatmul.mubr.f32.vlgmr.msra.gmra.mxu1 %v4379_v1  ;;  %3645 = vmatprep.subr.mxu0 %v4379_v1 }
  0xe0   : > { %3646 = vmatpush3.msra.mxu0 %v4841_v63  ;;  %3656 = vmatprep.subr.mxu1 %v4379_v1 }
  0xe1   : > { %3647 = vmatprep.subr.mxu0 %v4379_v1  ;;  %3657 = vmatpush3.msra.mxu1 %v4849_v6 }
  0xe2   : > { %3648 = vmatpush3.msra.mxu0 %v4847_v5  ;;  %3658 = vmatprep.subr.mxu1 %v4379_v1 }
  0xe3   : > { %3649 = vmatprep.subr.mxu0 %v4379_v1  ;;  %3653 = vmatprep.mubr.msk.f32.mxu0 %vm4381_vm0, %v4379_v1 }
  0xe4   : > { %3650 = vmatpush3.msra.mxu0 %v4857_v8  ;;  %3659 = vmatpush3.msra.mxu1 %v4859_v10 }
  0xe5   : > { %3651 = vmatprep.subr.mxu0 %v4379_v1  ;;  %3660 = vmatprep.subr.mxu1 %v4379_v1 }
  0xe6   : > { %3652 = vmatpush3.msra.mxu0 %v4865_v11  ;;  %3661 = vmatpush3.msra.mxu1 %v4867_v12 }
  0xe7   : > { %3662 = vmatprep.subr.mxu1 %v4379_v1  ;;  %3664 = vmatprep.mubr.msk.f32.mxu1 %vm4381_vm0, %v4379_v1 }
  0xe8   : > { %3663 = vmatpush3.msra.mxu1 %v4873_v13  ;;  %3667 = vmatprep.subr.mxu0 %v4379_v1 }
  0xe9   : > { %3678 = vmatprep.subr.mxu1 %v4379_v1 }
 0x195   : > { %v888_v20 = vpop.f32.mrf.mxu0 }
 0x196   : > { %v889_v22 = vadd.f32 %v3457_v18, %v888_v20 }
 0x197   : > { %v3611_v23 = vpop.f32.mrf.mxu0  ;;  %v1053_v24 = vpop.f32.mrf.mxu1 }
 0x198   : > { %v893_v25 = vcombine.high %v889_v22, %v889_v22  ;;  %v900_v27 = vrot.slane %v889_v22, %v4909_v19  ;;  %v1054_v28 = vadd.f32 %v3463_v21, %v1053_v24 }
 0x199   : > { %v3622_v29 = vpop.f32.mrf.mxu1 }
 0x19a   : > { %v907_v41 = vrot.slane %v893_v25, %v4909_v19  ;;  %v908_v42 = vcombine.high %v900_v27, %v900_v27  ;;  %v916_v43 = vrot.slane %v900_v27, %v4909_v19  ;;  %3459 = vst.sshfl [vmem:[#allocation2] sm:$0x1 pattern:$0x73625140] %v900_v27  ;;  %v1058_v44 = vcombine.high %v1054_v28, %v1054_v28 }
 0x19b   : > { %v1065_v47 = vrot.slane %v1054_v28, %v4909_v19 }
 0x19c   : > { %v909_v48 = vcombine.high %v907_v41, %v907_v41  ;;  %v923_v49 = vrot.slane %v907_v41, %v4909_v19  ;;  %v930_v50 = vrot.slane %v908_v42, %v4909_v19  ;;  %v938_v51 = vcombine.high %v916_v43, %v916_v43  ;;  %3460 = vst.sshfl [vmem:[#allocation2 + $0x1] sm:$0x1 pattern:$0x73625140] %v908_v42 }
 0x19d   : > { %3461 = vst.sshfl [vmem:[#allocation2 + $0x4] sm:$0x1 pattern:$0x73625140] %v907_v41  ;;  %v1072_v52 = vrot.slane %v1058_v44, %v4909_v19  ;;  %v1073_v53 = vcombine.high %v1065_v47, %v1065_v47  ;;  %v1081_v54 = vrot.slane %v1065_v47, %v4909_v19  ;;  %v1198_v55 = vpop.f32.mrf.mxu0 }
 0x19e   : > { %3465 = vst.sshfl [vmem:[#allocation3] sm:$0x1 pattern:$0x73625140] %v1065_v47  ;;  %v939_v56 = vcombine.high %v923_v49, %v923_v49  ;;  %v940_v57 = vcombine.high %v930_v50, %v930_v50  ;;  %950 = vst [vmem:[#allocation2 + $0x2] sm:$0x1] %v938_v51 }
 0x19f   : > { %3462 = vst.sshfl [vmem:[#allocation2 + $0x5] sm:$0x1 pattern:$0x73625140] %v909_v48  ;;  %v1074_v58 = vcombine.high %v1072_v52, %v1072_v52  ;;  %v1088_v59 = vrot.slane %v1072_v52, %v4909_v19  ;;  %v1095_v60 = vrot.slane %v1073_v53, %v4909_v19  ;;  %v1103_v61 = vcombine.high %v1081_v54, %v1081_v54  ;;  %v3633_v62 = vpop.f32.mrf.mxu0  ;;  %v1270_v0 = vpop.f32.mrf.mxu1 }
 0x1a0   : > { %3466 = vst.sshfl [vmem:[#allocation3 + $0x1] sm:$0x1 pattern:$0x73625140] %v1073_v53  ;;  %951 = vst [vmem:[#allocation2 + $0x3] sm:$0x1] %v940_v57 }
 0x1a1   : > { %3467 = vst.sshfl [vmem:[#allocation3 + $0x4] sm:$0x1 pattern:$0x73625140] %v1072_v52  ;;  %954 = vst [vmem:[#allocation2 + $0x6] sm:$0x1] %v939_v56  ;;  %v1104_v2 = vcombine.high %v1088_v59, %v1088_v59  ;;  %v1105_v3 = vcombine.high %v1095_v60, %v1095_v60  ;;  %v3644_v15 = vpop.f32.mrf.mxu1 }
 0x1a2   : > { %1115 = vst [vmem:[#allocation3 + $0x2] sm:$0x1] %v1103_v61  ;;  %3468 = vst.sshfl [vmem:[#allocation3 + $0x5] sm:$0x1 pattern:$0x73625140] %v1074_v58 }
 0x1a3   : > { %v1128_v7 = vld [vmem:[#allocation2] sm:$0x1]  ;;  %1116 = vst [vmem:[#allocation3 + $0x3] sm:$0x1] %v1105_v3  ;;  %1119 = vst [vmem:[#allocation3 + $0x6] sm:$0x1] %v1104_v2 }
 0x1a4   : > { %v1202_v16 = vadd.f32 %v1198_v55, %v1128_v7  ;;  %v4937_v56 = vsub.s32 0, %v4741_v4  ;;  %v1343_v2 = vld [vmem:[#allocation2 + $0x1] sm:$0x1] }
 0x1a5   : > { %v1203_v17 = vld [vmem:[#allocation3] sm:$0x1] }
 0x1a6   : > { %3925 = vtanh.f32 %v1202_v16  ;;  %v1274_v18 = vadd.f32 %v1270_v0, %v1203_v17  ;;  %v3469_v22 = vmul.f32 -1.442695, %v1202_v16 }
 0x1a7   : > { %v1418_v16 = vld [vmem:[#allocation3 + $0x1] sm:$0x1] }
 0x1a8   : > { %3927 = vtanh.f32 %v1274_v18  ;;  %v3470_v23 = vmul.f32 -1.442695, %v1274_v18 }
 0x1a9   : > { %3929 = vpow2.f32 %v3469_v22 }
 0x1aa   : > { %3931 = vpow2.f32 %v3470_v23 }
 0x1b3   : > { %v3926_v20 = vpop.eup %3925 }
 0x1b4   : > { %1291 = vrot.lane.b32.xlu0 %v3926_v20, %s4384_s12 }
 0x1b5   : > { %v3928_v21 = vpop.eup %3927 }
 0x1b6   : > { %v3930_v24 = vpop.eup %3929 }
 0x1b7   : > { %v1278_v25 = vadd.f32 1.0, %v3930_v24  ;;  %v3932_v27 = vpop.eup %3931 }
 0x1b8   : > { %1302 = vrot.lane.b32.xlu0 %v3928_v21, %s4384_s12  ;;  %v1284_v28 = vadd.f32 1.0, %v3932_v27 }
 0x1b9   : > { %3933 = vrcp.f32 %v1278_v25 }
 0x1ba   : > { %3935 = vrcp.f32 %v1284_v28 }
 0x1c6   : > { %v3934_v29 = vpop.eup %3933 }
 0x1c7   : > { %v3936_v43 = vpop.eup %3935  ;;  %v1289_v48 = vmul.f32 0.0, %v3934_v29 }
 0x1c8   : > { %v1300_v51 = vmul.f32 0.0, %v3936_v43 }
 0x226   : > { %v1292_v41 = vpop.permute.xlu0 %1291 }
 0x227   : > { %v1294_v42 = vmul.f32 %v3934_v29, %v1292_v41 }
 0x229   : > { %1296 = vrot.lane.b32.xlu1 %v1294_v42, %s4384_s12 }
 0x22a   : > { %v1303_v44 = vpop.permute.xlu0 %1302 }
 0x22b   : > { %v1305_v47 = vmul.f32 %v3936_v43, %v1303_v44 }
 0x22d   : > { %1307 = vrot.lane.b32.xlu1 %v1305_v47, %s4384_s12 }
 0x29b   : > { %v1297_v49 = vpop.permute.xlu1 %1296 }
 0x29c   : > { %v4928_v50 = vadd.f32 %v1297_v49, %v1289_v48 }
 0x29e   : > { %3937 = vtanh.f32 %v4928_v50 }
 0x29f   : > { %v1308_v52 = vpop.permute.xlu1 %1307 }
 0x2a0   : > { %v4931_v53 = vadd.f32 %v1308_v52, %v1300_v51 }
 0x2a2   : > { %3939 = vtanh.f32 %v4931_v53 }
 0x2ab   : > { %v3938_v54 = vpop.eup %3937 }
 0x2ac   : > { %1313 = vrot.lane.b32.xlu0 %v3938_v54, %s4384_s12 }
 0x2af   : > { %v3940_v55 = vpop.eup %3939 }
 0x2b0   : > { %1319 = vrot.lane.b32.xlu1 %v3940_v55, %s4384_s12 }
 0x31e   : > { %v1314_v57 = vpop.permute.xlu0 %1313 }
 0x31f   : > { %v1316_v58 = vmul.f32 %v3934_v29, %v1314_v57 }
 0x321   : > { %v1327_v59 = vrot.slane %v1316_v58, %v4937_v56 }
 0x322   : > { %v1320_v60 = vpop.permute.xlu1 %1319 }
 0x323   : > { %v1322_v61 = vmul.f32 %v3936_v43, %v1320_v60  ;;  %1328 = vrot.lane.b32.xlu0 %v1327_v59, %s4385_s26 }
 0x325   : > { %v1337_v62 = vrot.slane %v1322_v61, %v4937_v56 }
 0x327   : > { %1338 = vrot.lane.b32.xlu1 %v1337_v62, %s4385_s26 }
 0x395   : > { %v1329_v0 = vpop.permute.xlu0 %1328 }
 0x396   : > { %1332 = vst.msk [vmem:[#allocation4] sm:$0x1] %vm1331_vm8, %v1329_v0  ;;  %3654 = vmatmul.mubr.msk.f32.vlgmr.msra.gmra.mxu0 %vm819_vm7, %v1329_v0 }
 0x397   : > { %3668 = vmatpush3.msra.mxu0 %v4841_v63  ;;  %3675 = vmatprep.mubr.msk.f32.mxu0 %vm4381_vm0, %v4379_v1 }
 0x398   : > { %3669 = vmatprep.subr.mxu0 %v4379_v1 }
 0x399   : > { %v1339_v4 = vpop.permute.xlu1 %1338  ;;  %3670 = vmatpush3.msra.mxu0 %v4847_v5 }
 0x39a   : > { %1341 = vst.msk [vmem:[#allocation5] sm:$0x1] %vm1331_vm8, %v1339_v4  ;;  %3665 = vmatmul.mubr.msk.f32.vlgmr.msra.gmra.mxu1 %vm819_vm7, %v1339_v4  ;;  %3671 = vmatprep.subr.mxu0 %v4379_v1 }
 0x39b   : > { %3672 = vmatpush3.msra.mxu0 %v4857_v8  ;;  %3679 = vmatpush3.msra.mxu1 %v4849_v6 }
 0x39c   : > { %3673 = vmatprep.subr.mxu0 %v4379_v1  ;;  %3680 = vmatprep.subr.mxu1 %v4379_v1 }
 0x39d   : > { %3674 = vmatpush3.msra.mxu0 %v4865_v11  ;;  %3681 = vmatpush3.msra.mxu1 %v4859_v10 }
 0x39e   : > { %3682 = vmatprep.subr.mxu1 %v4379_v1  ;;  %3686 = vmatprep.mubr.msk.f32.mxu1 %vm4381_vm0, %v4379_v1 }
 0x39f   : > { %3683 = vmatpush3.msra.mxu1 %v4867_v12  ;;  %3689 = vmatprep.subr.mxu0 %v4379_v1 }
 0x3a0   : > { %3684 = vmatprep.subr.mxu1 %v4379_v1 }
 0x3a1   : > { %3685 = vmatpush3.msra.mxu1 %v4873_v13 }
 0x3a2   : > { %3700 = vmatprep.subr.mxu1 %v4379_v1 }
 0x456   : > { %v1412_v3 = vpop.f32.mrf.mxu0 }
 0x457   : > { %v1416_v7 = vadd.f32 %v1412_v3, %v1343_v2  ;;  %v1561_v3 = vld [vmem:[#allocation2 + $0x2] sm:$0x1] }
 0x458   : > { %v3655_v15 = vpop.f32.mrf.mxu0 }
 0x459   : > { %3941 = vtanh.f32 %v1416_v7  ;;  %v3473_v23 = vmul.f32 -1.442695, %v1416_v7 }
 0x45a   : > { %v1487_v17 = vpop.f32.mrf.mxu1 }
 0x45b   : > { %v1491_v18 = vadd.f32 %v1487_v17, %v1418_v16  ;;  %v1636_v17 = vld [vmem:[#allocation3 + $0x2] sm:$0x1] }
 0x45c   : > { %v3666_v20 = vpop.f32.mrf.mxu1 }
 0x45d   : > { %3943 = vtanh.f32 %v1491_v18  ;;  %v3474_v24 = vmul.f32 -1.442695, %v1491_v18 }
 0x45e   : > { %3945 = vpow2.f32 %v3473_v23 }
 0x45f   : > { %3947 = vpow2.f32 %v3474_v24 }
 0x466   : > { %v3942_v21 = vpop.eup %3941 }
 0x467   : > { %1508 = vrot.lane.b32.xlu0 %v3942_v21, %s4384_s12 }
 0x46a   : > { %v3944_v22 = vpop.eup %3943 }
 0x46b   : > { %1519 = vrot.lane.b32.xlu1 %v3944_v22, %s4384_s12  ;;  %v3946_v25 = vpop.eup %3945 }
 0x46c   : > { %v1495_v27 = vadd.f32 1.0, %v3946_v25  ;;  %v3948_v28 = vpop.eup %3947 }
 0x46d   : > { %v1501_v29 = vadd.f32 1.0, %v3948_v28 }
 0x46e   : > { %3949 = vrcp.f32 %v1495_v27 }
 0x46f   : > { %3951 = vrcp.f32 %v1501_v29 }
 0x47b   : > { %v3950_v41 = vpop.eup %3949 }
 0x47c   : > { %v3952_v44 = vpop.eup %3951  ;;  %v1506_v49 = vmul.f32 %v3950_v41, %v4928_v50 }
 0x47d   : > { %v1517_v54 = vmul.f32 %v3952_v44, %v4931_v53 }
 0x4d9   : > { %v1509_v42 = vpop.permute.xlu0 %1508 }
 0x4da   : > { %v1511_v43 = vmul.f32 %v3950_v41, %v1509_v42 }
 0x4dc   : > { %1513 = vrot.lane.b32.xlu0 %v1511_v43, %s4384_s12 }
 0x4dd   : > { %v1520_v47 = vpop.permute.xlu1 %1519 }
 0x4de   : > { %v1522_v48 = vmul.f32 %v3952_v44, %v1520_v47 }
 0x4e0   : > { %1524 = vrot.lane.b32.xlu1 %v1522_v48, %s4384_s12 }
 0x54e   : > { %v1514_v51 = vpop.permute.xlu0 %1513 }
 0x54f   : > { %v4972_v52 = vadd.f32 %v1514_v51, %v1506_v49 }
 0x551   : > { %3953 = vtanh.f32 %v4972_v52 }
 0x552   : > { %v1525_v55 = vpop.permute.xlu1 %1524 }
 0x553   : > { %v4976_v57 = vadd.f32 %v1525_v55, %v1517_v54 }
 0x555   : > { %3955 = vtanh.f32 %v4976_v57 }
 0x55e   : > { %v3954_v58 = vpop.eup %3953 }
 0x55f   : > { %1530 = vrot.lane.b32.xlu0 %v3954_v58, %s4384_s12 }
 0x562   : > { %v3956_v59 = vpop.eup %3955 }
 0x563   : > { %1536 = vrot.lane.b32.xlu1 %v3956_v59, %s4384_s12 }
 0x5d1   : > { %v1531_v60 = vpop.permute.xlu0 %1530 }
 0x5d2   : > { %v1533_v50 = vmul.f32 %v3950_v41, %v1531_v60 }
 0x5d4   : > { %v1544_v61 = vrot.slane %v1533_v50, %v4937_v56 }
 0x5d5   : > { %v1537_v62 = vpop.permute.xlu1 %1536 }
 0x5d6   : > { %v1539_v0 = vmul.f32 %v3952_v44, %v1537_v62  ;;  %1545 = vrot.lane.b32.xlu0 %v1544_v61, %s4385_s26 }
 0x5d8   : > { %v1554_v53 = vrot.slane %v1539_v0, %v4937_v56 }
 0x5da   : > { %1555 = vrot.lane.b32.xlu1 %v1554_v53, %s4385_s26 }
 0x648   : > { %v1546_v4 = vpop.permute.xlu0 %1545 }
 0x649   : > { %1549 = vst.msk [vmem:[#allocation4 + $0x1] sm:$0x1] %vm1331_vm8, %v1546_v4  ;;  %3676 = vmatmul.mubr.msk.f32.vlgmr.msra.gmra.mxu0 %vm819_vm7, %v1546_v4 }
 0x64a   : > { %3690 = vmatpush3.msra.mxu0 %v4841_v63  ;;  %3697 = vmatprep.mubr.msk.f32.mxu0 %vm4381_vm0, %v4379_v1 }
 0x64b   : > { %3691 = vmatprep.subr.mxu0 %v4379_v1 }
 0x64c   : > { %v1556_v2 = vpop.permute.xlu1 %1555  ;;  %3692 = vmatpush3.msra.mxu0 %v4847_v5 }
 0x64d   : > { %1559 = vst.msk [vmem:[#allocation5 + $0x1] sm:$0x1] %vm1331_vm8, %v1556_v2  ;;  %3687 = vmatmul.mubr.msk.f32.vlgmr.msra.gmra.mxu1 %vm819_vm7, %v1556_v2  ;;  %3693 = vmatprep.subr.mxu0 %v4379_v1 }
 0x64e   : > { %3694 = vmatpush3.msra.mxu0 %v4857_v8  ;;  %3701 = vmatpush3.msra.mxu1 %v4849_v6 }
 0x64f   : > { %3695 = vmatprep.subr.mxu0 %v4379_v1  ;;  %3702 = vmatprep.subr.mxu1 %v4379_v1 }
 0x650   : > { %3696 = vmatpush3.msra.mxu0 %v4865_v11  ;;  %3703 = vmatpush3.msra.mxu1 %v4859_v10 }
 0x651   : > { %3704 = vmatprep.subr.mxu1 %v4379_v1  ;;  %3708 = vmatprep.mubr.msk.f32.mxu1 %vm4381_vm0, %v4379_v1 }
 0x652   : > { %3705 = vmatpush3.msra.mxu1 %v4867_v12  ;;  %3711 = vmatprep.subr.mxu0 %v4379_v1 }
 0x653   : > { %3706 = vmatprep.subr.mxu1 %v4379_v1 }
 0x654   : > { %3707 = vmatpush3.msra.mxu1 %v4873_v13 }
 0x655   : > { %3722 = vmatprep.subr.mxu1 %v4379_v1 }
 0x709   : > { %v1630_v7 = vpop.f32.mrf.mxu0 }
 0x70a   : > { %v1634_v15 = vadd.f32 %v1630_v7, %v1561_v3  ;;  %v1779_v7 = vld [vmem:[#allocation2 + $0x3] sm:$0x1] }
 0x70b   : > { %v3677_v16 = vpop.f32.mrf.mxu0 }
 0x70c   : > { %3957 = vtanh.f32 %v1634_v15  ;;  %v3477_v24 = vmul.f32 -1.442695, %v1634_v15 }
 0x70d   : > { %v1705_v18 = vpop.f32.mrf.mxu1 }
 0x70e   : > { %v1709_v20 = vadd.f32 %v1705_v18, %v1636_v17  ;;  %v1854_v18 = vld [vmem:[#allocation3 + $0x3] sm:$0x1] }
 0x70f   : > { %v3688_v21 = vpop.f32.mrf.mxu1 }
 0x710   : > { %3959 = vtanh.f32 %v1709_v20  ;;  %v3478_v25 = vmul.f32 -1.442695, %v1709_v20 }
 0x711   : > { %3961 = vpow2.f32 %v3477_v24 }
 0x712   : > { %3963 = vpow2.f32 %v3478_v25 }
 0x719   : > { %v3958_v22 = vpop.eup %3957 }
 0x71a   : > { %1726 = vrot.lane.b32.xlu0 %v3958_v22, %s4384_s12 }
 0x71d   : > { %v3960_v23 = vpop.eup %3959 }
 0x71e   : > { %1737 = vrot.lane.b32.xlu1 %v3960_v23, %s4384_s12  ;;  %v3962_v27 = vpop.eup %3961 }
 0x71f   : > { %v1713_v28 = vadd.f32 1.0, %v3962_v27  ;;  %v3964_v29 = vpop.eup %3963 }
 0x720   : > { %v1719_v41 = vadd.f32 1.0, %v3964_v29 }
 0x721   : > { %3965 = vrcp.f32 %v1713_v28 }
 0x722   : > { %3967 = vrcp.f32 %v1719_v41 }
 0x72e   : > { %v3966_v42 = vpop.eup %3965 }
 0x72f   : > { %v3968_v47 = vpop.eup %3967  ;;  %v1724_v51 = vmul.f32 %v3966_v42, %v4972_v52 }
 0x730   : > { %v1735_v58 = vmul.f32 %v3968_v47, %v4976_v57 }
 0x78c   : > { %v1727_v43 = vpop.permute.xlu0 %1726 }
 0x78d   : > { %v1729_v44 = vmul.f32 %v3966_v42, %v1727_v43 }
 0x78f   : > { %1731 = vrot.lane.b32.xlu0 %v1729_v44, %s4384_s12 }
 0x790   : > { %v1738_v48 = vpop.permute.xlu1 %1737 }
 0x791   : > { %v1740_v49 = vmul.f32 %v3968_v47, %v1738_v48 }
 0x793   : > { %1742 = vrot.lane.b32.xlu1 %v1740_v49, %s4384_s12 }
 0x801   : > { %v1732_v54 = vpop.permute.xlu0 %1731 }
 0x802   : > { %v5014_v55 = vadd.f32 %v1732_v54, %v1724_v51 }
 0x804   : > { %3969 = vtanh.f32 %v5014_v55 }
 0x805   : > { %v1743_v59 = vpop.permute.xlu1 %1742 }
 0x806   : > { %v5018_v60 = vadd.f32 %v1743_v59, %v1735_v58 }
 0x808   : > { %3971 = vtanh.f32 %v5018_v60 }
 0x811   : > { %v3970_v50 = vpop.eup %3969 }
 0x812   : > { %1748 = vrot.lane.b32.xlu0 %v3970_v50, %s4384_s12 }
 0x815   : > { %v3972_v61 = vpop.eup %3971 }
 0x816   : > { %1754 = vrot.lane.b32.xlu1 %v3972_v61, %s4384_s12 }
 0x884   : > { %v1749_v62 = vpop.permute.xlu0 %1748 }
 0x885   : > { %v1751_v52 = vmul.f32 %v3966_v42, %v1749_v62 }
 0x887   : > { %v1762_v0 = vrot.slane %v1751_v52, %v4937_v56 }
 0x888   : > { %v1755_v53 = vpop.permute.xlu1 %1754 }
 0x889   : > { %v1757_v4 = vmul.f32 %v3968_v47, %v1755_v53  ;;  %1763 = vrot.lane.b32.xlu0 %v1762_v0, %s4385_s26 }
 0x88b   : > { %v1772_v57 = vrot.slane %v1757_v4, %v4937_v56 }
 0x88d   : > { %1773 = vrot.lane.b32.xlu1 %v1772_v57, %s4385_s26 }
 0x8fb   : > { %v1764_v2 = vpop.permute.xlu0 %1763 }
 0x8fc   : > { %1767 = vst.msk [vmem:[#allocation4 + $0x2] sm:$0x1] %vm1331_vm8, %v1764_v2  ;;  %3698 = vmatmul.mubr.msk.f32.vlgmr.msra.gmra.mxu0 %vm819_vm7, %v1764_v2 }
 0x8fd   : > { %3712 = vmatpush3.msra.mxu0 %v4841_v63  ;;  %3719 = vmatprep.mubr.msk.f32.mxu0 %vm4381_vm0, %v4379_v1 }
 0x8fe   : > { %3713 = vmatprep.subr.mxu0 %v4379_v1 }
 0x8ff   : > { %v1774_v3 = vpop.permute.xlu1 %1773  ;;  %3714 = vmatpush3.msra.mxu0 %v4847_v5 }
 0x900   : > { %1777 = vst.msk [vmem:[#allocation5 + $0x2] sm:$0x1] %vm1331_vm8, %v1774_v3  ;;  %3709 = vmatmul.mubr.msk.f32.vlgmr.msra.gmra.mxu1 %vm819_vm7, %v1774_v3  ;;  %3715 = vmatprep.subr.mxu0 %v4379_v1 }
 0x901   : > { %3716 = vmatpush3.msra.mxu0 %v4857_v8  ;;  %3723 = vmatpush3.msra.mxu1 %v4849_v6 }
 0x902   : > { %3717 = vmatprep.subr.mxu0 %v4379_v1  ;;  %3724 = vmatprep.subr.mxu1 %v4379_v1 }
 0x903   : > { %3718 = vmatpush3.msra.mxu0 %v4865_v11  ;;  %3725 = vmatpush3.msra.mxu1 %v4859_v10 }
 0x904   : > { %3726 = vmatprep.subr.mxu1 %v4379_v1  ;;  %3730 = vmatprep.mubr.msk.f32.mxu1 %vm4381_vm0, %v4379_v1 }
 0x905   : > { %3727 = vmatpush3.msra.mxu1 %v4867_v12  ;;  %3733 = vmatprep.subr.mxu0 %v4379_v1 }
 0x906   : > { %3728 = vmatprep.subr.mxu1 %v4379_v1 }
 0x907   : > { %3729 = vmatpush3.msra.mxu1 %v4873_v13 }
 0x908   : > { %3744 = vmatprep.subr.mxu1 %v4379_v1 }
 0x9bc   : > { %v1848_v15 = vpop.f32.mrf.mxu0 }
 0x9bd   : > { %v1852_v16 = vadd.f32 %v1848_v15, %v1779_v7  ;;  %v1997_v15 = vld [vmem:[#allocation2 + $0x4] sm:$0x1] }
 0x9be   : > { %v3699_v17 = vpop.f32.mrf.mxu0 }
 0x9bf   : > { %3973 = vtanh.f32 %v1852_v16  ;;  %v3481_v25 = vmul.f32 -1.442695, %v1852_v16 }
 0x9c0   : > { %v1923_v20 = vpop.f32.mrf.mxu1 }
 0x9c1   : > { %v1927_v21 = vadd.f32 %v1923_v20, %v1854_v18  ;;  %v2072_v20 = vld [vmem:[#allocation3 + $0x4] sm:$0x1] }
 0x9c2   : > { %v3710_v22 = vpop.f32.mrf.mxu1 }
 0x9c3   : > { %3975 = vtanh.f32 %v1927_v21  ;;  %v3482_v27 = vmul.f32 -1.442695, %v1927_v21 }
 0x9c4   : > { %3977 = vpow2.f32 %v3481_v25 }
 0x9c5   : > { %3979 = vpow2.f32 %v3482_v27 }
 0x9cc   : > { %v3974_v23 = vpop.eup %3973 }
 0x9cd   : > { %1944 = vrot.lane.b32.xlu0 %v3974_v23, %s4384_s12 }
 0x9d0   : > { %v3976_v24 = vpop.eup %3975 }
 0x9d1   : > { %1955 = vrot.lane.b32.xlu1 %v3976_v24, %s4384_s12  ;;  %v3978_v28 = vpop.eup %3977 }
 0x9d2   : > { %v1931_v29 = vadd.f32 1.0, %v3978_v28  ;;  %v3980_v41 = vpop.eup %3979 }
 0x9d3   : > { %v1937_v42 = vadd.f32 1.0, %v3980_v41 }
 0x9d4   : > { %3981 = vrcp.f32 %v1931_v29 }
 0x9d5   : > { %3983 = vrcp.f32 %v1937_v42 }
 0x9e1   : > { %v3982_v43 = vpop.eup %3981 }
 0x9e2   : > { %v3984_v48 = vpop.eup %3983  ;;  %v1942_v54 = vmul.f32 %v3982_v43, %v5014_v55 }
 0x9e3   : > { %v1953_v50 = vmul.f32 %v3984_v48, %v5018_v60 }
 0xa3f   : > { %v1945_v44 = vpop.permute.xlu0 %1944 }
 0xa40   : > { %v1947_v47 = vmul.f32 %v3982_v43, %v1945_v44 }
 0xa42   : > { %1949 = vrot.lane.b32.xlu0 %v1947_v47, %s4384_s12 }
 0xa43   : > { %v1956_v49 = vpop.permute.xlu1 %1955 }
 0xa44   : > { %v1958_v51 = vmul.f32 %v3984_v48, %v1956_v49 }
 0xa46   : > { %1960 = vrot.lane.b32.xlu1 %v1958_v51, %s4384_s12 }
 0xab4   : > { %v1950_v58 = vpop.permute.xlu0 %1949 }
 0xab5   : > { %v5056_v59 = vadd.f32 %v1950_v58, %v1942_v54 }
 0xab7   : > { %3985 = vtanh.f32 %v5056_v59 }
 0xab8   : > { %v1961_v61 = vpop.permute.xlu1 %1960 }
 0xab9   : > { %v5060_v62 = vadd.f32 %v1961_v61, %v1953_v50 }
 0xabb   : > { %3987 = vtanh.f32 %v5060_v62 }
 0xac4   : > { %v3986_v52 = vpop.eup %3985 }
 0xac5   : > { %1966 = vrot.lane.b32.xlu0 %v3986_v52, %s4384_s12 }
 0xac8   : > { %v3988_v0 = vpop.eup %3987 }
 0xac9   : > { %1972 = vrot.lane.b32.xlu1 %v3988_v0, %s4384_s12 }
 0xb37   : > { %v1967_v53 = vpop.permute.xlu0 %1966 }
 0xb38   : > { %v1969_v55 = vmul.f32 %v3982_v43, %v1967_v53 }
 0xb3a   : > { %v1980_v4 = vrot.slane %v1969_v55, %v4937_v56 }
 0xb3b   : > { %v1973_v57 = vpop.permute.xlu1 %1972 }
 0xb3c   : > { %v1975_v2 = vmul.f32 %v3984_v48, %v1973_v57  ;;  %1981 = vrot.lane.b32.xlu0 %v1980_v4, %s4385_s26 }
 0xb3e   : > { %v1990_v60 = vrot.slane %v1975_v2, %v4937_v56 }
 0xb40   : > { %1991 = vrot.lane.b32.xlu1 %v1990_v60, %s4385_s26 }
 0xbae   : > { %v1982_v3 = vpop.permute.xlu0 %1981 }
 0xbaf   : > { %1985 = vst.msk [vmem:[#allocation4 + $0x3] sm:$0x1] %vm1331_vm8, %v1982_v3  ;;  %3720 = vmatmul.mubr.msk.f32.vlgmr.msra.gmra.mxu0 %vm819_vm7, %v1982_v3 }
 0xbb0   : > { %3734 = vmatpush3.msra.mxu0 %v4841_v63  ;;  %3741 = vmatprep.mubr.msk.f32.mxu0 %vm4381_vm0, %v4379_v1 }
 0xbb1   : > { %3735 = vmatprep.subr.mxu0 %v4379_v1 }
 0xbb2   : > { %v1992_v7 = vpop.permute.xlu1 %1991  ;;  %3736 = vmatpush3.msra.mxu0 %v4847_v5 }
 0xbb3   : > { %1995 = vst.msk [vmem:[#allocation5 + $0x3] sm:$0x1] %vm1331_vm8, %v1992_v7  ;;  %3731 = vmatmul.mubr.msk.f32.vlgmr.msra.gmra.mxu1 %vm819_vm7, %v1992_v7  ;;  %3737 = vmatprep.subr.mxu0 %v4379_v1 }
 0xbb4   : > { %3738 = vmatpush3.msra.mxu0 %v4857_v8  ;;  %3745 = vmatpush3.msra.mxu1 %v4849_v6 }
 0xbb5   : > { %3739 = vmatprep.subr.mxu0 %v4379_v1  ;;  %3746 = vmatprep.subr.mxu1 %v4379_v1 }
 0xbb6   : > { %3740 = vmatpush3.msra.mxu0 %v4865_v11  ;;  %3747 = vmatpush3.msra.mxu1 %v4859_v10 }
 0xbb7   : > { %3748 = vmatprep.subr.mxu1 %v4379_v1  ;;  %3752 = vmatprep.mubr.msk.f32.mxu1 %vm4381_vm0, %v4379_v1 }
 0xbb8   : > { %3749 = vmatpush3.msra.mxu1 %v4867_v12  ;;  %3755 = vmatprep.subr.mxu0 %v4379_v1 }
 0xbb9   : > { %3750 = vmatprep.subr.mxu1 %v4379_v1 }
 0xbba   : > { %3751 = vmatpush3.msra.mxu1 %v4873_v13 }
 0xbbb   : > { %3766 = vmatprep.subr.mxu1 %v4379_v1 }
 0xc6f   : > { %v2066_v16 = vpop.f32.mrf.mxu0 }
 0xc70   : > { %v2070_v17 = vadd.f32 %v2066_v16, %v1997_v15 }
 0xc71   : > { %v3721_v18 = vpop.f32.mrf.mxu0 }
 0xc72   : > { %3989 = vtanh.f32 %v2070_v17  ;;  %v3485_v27 = vmul.f32 -1.442695, %v2070_v17 }
 0xc73   : > { %v2141_v21 = vpop.f32.mrf.mxu1 }
 0xc74   : > { %v2145_v22 = vadd.f32 %v2141_v21, %v2072_v20 }
 0xc75   : > { %v3732_v23 = vpop.f32.mrf.mxu1 }
 0xc76   : > { %3991 = vtanh.f32 %v2145_v22  ;;  %v3486_v28 = vmul.f32 -1.442695, %v2145_v22 }
 0xc77   : > { %3993 = vpow2.f32 %v3485_v27 }
 0xc78   : > { %3995 = vpow2.f32 %v3486_v28 }
 0xc7f   : > { %v3990_v24 = vpop.eup %3989 }
 0xc80   : > { %2162 = vrot.lane.b32.xlu0 %v3990_v24, %s4384_s12 }
 0xc83   : > { %v3992_v25 = vpop.eup %3991 }
 0xc84   : > { %2173 = vrot.lane.b32.xlu1 %v3992_v25, %s4384_s12  ;;  %v3994_v29 = vpop.eup %3993 }
 0xc85   : > { %v2149_v41 = vadd.f32 1.0, %v3994_v29  ;;  %v3996_v42 = vpop.eup %3995 }
 0xc86   : > { %v2155_v43 = vadd.f32 1.0, %v3996_v42 }
 0xc87   : > { %3997 = vrcp.f32 %v2149_v41 }
 0xc88   : > { %3999 = vrcp.f32 %v2155_v43 }
 0xc94   : > { %v3998_v44 = vpop.eup %3997 }
 0xc95   : > { %v4000_v49 = vpop.eup %3999  ;;  %v2160_v58 = vmul.f32 %v3998_v44, %v5056_v59 }
 0xc96   : > { %v2171_v52 = vmul.f32 %v4000_v49, %v5060_v62 }
 0xcf2   : > { %v2163_v47 = vpop.permute.xlu0 %2162 }
 0xcf3   : > { %v2165_v48 = vmul.f32 %v3998_v44, %v2163_v47 }
 0xcf5   : > { %2167 = vrot.lane.b32.xlu0 %v2165_v48, %s4384_s12 }
 0xcf6   : > { %v2174_v51 = vpop.permute.xlu1 %2173 }
 0xcf7   : > { %v2176_v54 = vmul.f32 %v4000_v49, %v2174_v51 }
 0xcf9   : > { %2178 = vrot.lane.b32.xlu1 %v2176_v54, %s4384_s12 }
 0xd67   : > { %v2168_v50 = vpop.permute.xlu0 %2167 }
 0xd68   : > { %v5098_v61 = vadd.f32 %v2168_v50, %v2160_v58 }
 0xd6a   : > { %4001 = vtanh.f32 %v5098_v61 }
 0xd6b   : > { %v2179_v0 = vpop.permute.xlu1 %2178 }
 0xd6c   : > { %v5102_v53 = vadd.f32 %v2179_v0, %v2171_v52 }
 0xd6e   : > { %4003 = vtanh.f32 %v5102_v53 }
 0xd77   : > { %v4002_v55 = vpop.eup %4001 }
 0xd78   : > { %2184 = vrot.lane.b32.xlu0 %v4002_v55, %s4384_s12 }
 0xd7b   : > { %v4004_v4 = vpop.eup %4003 }
 0xd7c   : > { %2190 = vrot.lane.b32.xlu1 %v4004_v4, %s4384_s12 }
 0xdea   : > { %v2185_v57 = vpop.permute.xlu0 %2184 }
 0xdeb   : > { %v2187_v59 = vmul.f32 %v3998_v44, %v2185_v57 }
 0xded   : > { %v2198_v2 = vrot.slane %v2187_v59, %v4937_v56  ;;  %v2433_v59 = vld [vmem:[#allocation2 + $0x6] sm:$0x1] }
 0xdee   : > { %v2191_v60 = vpop.permute.xlu1 %2190 }
 0xdef   : > { %v2193_v3 = vmul.f32 %v4000_v49, %v2191_v60  ;;  %2199 = vrot.lane.b32.xlu0 %v2198_v2, %s4385_s26 }
 0xdf1   : > { %v2208_v62 = vrot.slane %v2193_v3, %v4937_v56 }
 0xdf3   : > { %2209 = vrot.lane.b32.xlu1 %v2208_v62, %s4385_s26  ;;  %v2508_v62 = vld [vmem:[#allocation3 + $0x6] sm:$0x1] }
 0xe61   : > { %v2200_v7 = vpop.permute.xlu0 %2199 }
 0xe62   : > { %2203 = vst.msk [vmem:[#allocation4 + $0x4] sm:$0x1] %vm1331_vm8, %v2200_v7  ;;  %3742 = vmatmul.mubr.msk.f32.vlgmr.msra.gmra.mxu0 %vm819_vm7, %v2200_v7 }
 0xe63   : > { %3756 = vmatpush3.msra.mxu0 %v4841_v63  ;;  %3763 = vmatprep.mubr.msk.f32.mxu0 %vm4381_vm0, %v4379_v1  ;;  %v2215_v63 = vld [vmem:[#allocation2 + $0x5] sm:$0x1] }
 0xe64   : > { %3757 = vmatprep.subr.mxu0 %v4379_v1 }
 0xe65   : > { %v2210_v15 = vpop.permute.xlu1 %2209  ;;  %3758 = vmatpush3.msra.mxu0 %v4847_v5 }
 0xe66   : > { %2213 = vst.msk [vmem:[#allocation5 + $0x4] sm:$0x1] %vm1331_vm8, %v2210_v15  ;;  %3753 = vmatmul.mubr.msk.f32.vlgmr.msra.gmra.mxu1 %vm819_vm7, %v2210_v15  ;;  %3759 = vmatprep.subr.mxu0 %v4379_v1 }
 0xe67   : > { %3760 = vmatpush3.msra.mxu0 %v4857_v8  ;;  %3767 = vmatpush3.msra.mxu1 %v4849_v6 }
 0xe68   : > { %3761 = vmatprep.subr.mxu0 %v4379_v1  ;;  %3768 = vmatprep.subr.mxu1 %v4379_v1 }
 0xe69   : > { %3762 = vmatpush3.msra.mxu0 %v4865_v11  ;;  %3769 = vmatpush3.msra.mxu1 %v4859_v10  ;;  %v2290_v10 = vld [vmem:[#allocation3 + $0x5] sm:$0x1] }
 0xe6a   : > { %3770 = vmatprep.subr.mxu1 %v4379_v1  ;;  %3774 = vmatprep.mubr.msk.f32.mxu1 %vm4381_vm0, %v4379_v1 }
 0xe6b   : > { %3771 = vmatpush3.msra.mxu1 %v4867_v12  ;;  %3777 = vmatprep.subr.mxu0 %v4379_v1 }
 0xe6c   : > { %3772 = vmatprep.subr.mxu1 %v4379_v1 }
 0xe6d   : > { %3773 = vmatpush3.msra.mxu1 %v4873_v13 }
 0xe6e   : > { %3788 = vmatprep.subr.mxu1 %v4379_v1 }
 0xf22   : > { %v2284_v5 = vpop.f32.mrf.mxu0 }
 0xf23   : > { %v2288_v6 = vadd.f32 %v2284_v5, %v2215_v63 }
 0xf24   : > { %v3743_v8 = vpop.f32.mrf.mxu0 }
 0xf25   : > { %4005 = vtanh.f32 %v2288_v6  ;;  %v3489_v20 = vmul.f32 -1.442695, %v2288_v6 }
 0xf26   : > { %v2359_v11 = vpop.f32.mrf.mxu1 }
 0xf27   : > { %v2363_v16 = vadd.f32 %v2359_v11, %v2290_v10 }
 0xf28   : > { %v3754_v17 = vpop.f32.mrf.mxu1 }
 0xf29   : > { %4007 = vtanh.f32 %v2363_v16  ;;  %v3490_v13 = vmul.f32 -1.442695, %v2363_v16 }
 0xf2a   : > { %4009 = vpow2.f32 %v3489_v20 }
 0xf2b   : > { %4011 = vpow2.f32 %v3490_v13 }
 0xf32   : > { %v4006_v18 = vpop.eup %4005 }
 0xf33   : > { %2380 = vrot.lane.b32.xlu0 %v4006_v18, %s4384_s12 }
 0xf36   : > { %v4008_v12 = vpop.eup %4007 }
 0xf37   : > { %2391 = vrot.lane.b32.xlu1 %v4008_v12, %s4384_s12  ;;  %v4010_v21 = vpop.eup %4009 }
 0xf38   : > { %v2367_v22 = vadd.f32 1.0, %v4010_v21  ;;  %v4012_v23 = vpop.eup %4011 }
 0xf39   : > { %v2373_v24 = vadd.f32 1.0, %v4012_v23 }
 0xf3a   : > { %4013 = vrcp.f32 %v2367_v22 }
 0xf3b   : > { %4015 = vrcp.f32 %v2373_v24 }
 0xf47   : > { %v4014_v25 = vpop.eup %4013 }
 0xf48   : > { %v4016_v29 = vpop.eup %4015  ;;  %v2378_v43 = vmul.f32 %v4014_v25, %v5098_v61 }
 0xf49   : > { %v2389_v48 = vmul.f32 %v4016_v29, %v5102_v53 }
 0xfa5   : > { %v2381_v27 = vpop.permute.xlu0 %2380 }
 0xfa6   : > { %v2383_v28 = vmul.f32 %v4014_v25, %v2381_v27 }
 0xfa8   : > { %2385 = vrot.lane.b32.xlu0 %v2383_v28, %s4384_s12 }
 0xfa9   : > { %v2392_v41 = vpop.permute.xlu1 %2391 }
 0xfaa   : > { %v2394_v42 = vmul.f32 %v4016_v29, %v2392_v41 }
 0xfac   : > { %2396 = vrot.lane.b32.xlu1 %v2394_v42, %s4384_s12 }
0x101a   : > { %v2386_v44 = vpop.permute.xlu0 %2385 }
0x101b   : > { %v2388_v47 = vadd.f32 %v2386_v44, %v2378_v43  ;;  %v2660_v44 = vld [vmem:[#allocation14 + $0x18] sm:$0xff] }
0x101d   : > { %4017 = vtanh.f32 %v2388_v47 }
0x101e   : > { %v2397_v49 = vpop.permute.xlu1 %2396 }
0x101f   : > { %v2399_v51 = vadd.f32 %v2397_v49, %v2389_v48  ;;  %v2659_v48 = vld [vmem:[#allocation14 + $0x10] sm:$0xff]  ;;  %v2946_v49 = vld [vmem:[#allocation18 + $0x18] sm:$0xff] }
0x1021   : > { %4019 = vtanh.f32 %v2399_v51 }
0x102a   : > { %v4018_v54 = vpop.eup %4017 }
0x102b   : > { %2402 = vrot.lane.b32.xlu0 %v4018_v54, %s4384_s12  ;;  %v2945_v54 = vld [vmem:[#allocation18 + $0x10] sm:$0xff] }
0x102e   : > { %v4020_v58 = vpop.eup %4019 }
0x102f   : > { %2408 = vrot.lane.b32.xlu1 %v4020_v58, %s4384_s12  ;;  %v2657_v58 = vld [vmem:[#allocation14] sm:$0xff] }
0x109d   : > { %v2403_v50 = vpop.permute.xlu0 %2402 }
0x109e   : > { %v2405_v52 = vmul.f32 %v4014_v25, %v2403_v50 }
0x10a0   : > { %v2416_v0 = vrot.slane %v2405_v52, %v4937_v56 }
0x10a1   : > { %v2409_v55 = vpop.permute.xlu1 %2408 }
0x10a2   : > { %v2411_v61 = vmul.f32 %v4016_v29, %v2409_v55  ;;  %2417 = vrot.lane.b32.xlu0 %v2416_v0, %s4385_s26 }
0x10a4   : > { %v2426_v4 = vrot.slane %v2411_v61, %v4937_v56  ;;  %v2944_v61 = vld [vmem:[#allocation18 + $0x8] sm:$0xff] }
0x10a6   : > { %2427 = vrot.lane.b32.xlu1 %v2426_v4, %s4385_s26  ;;  %v2943_v4 = vld [vmem:[#allocation18] sm:$0xff] }
0x1114   : > { %v2418_v53 = vpop.permute.xlu0 %2417 }
0x1115   : > { %2421 = vst.msk [vmem:[#allocation4 + $0x5] sm:$0x1] %vm1331_vm8, %v2418_v53  ;;  %3764 = vmatmul.mubr.msk.f32.vlgmr.msra.gmra.mxu0 %vm819_vm7, %v2418_v53 }
0x1116   : > { %3785 = vmatprep.mubr.msk.f32.mxu0 %vm4381_vm0, %v4379_v1  ;;  %3778 = vmatpush3.msra.mxu0 %v2660_v44 }
0x1117   : > { %3779 = vmatprep.subr.mxu0 %v4379_v1 }
0x1118   : > { %v2428_v57 = vpop.permute.xlu1 %2427  ;;  %3780 = vmatpush3.msra.mxu0 %v2659_v48 }
0x1119   : > { %2431 = vst.msk [vmem:[#allocation5 + $0x5] sm:$0x1] %vm1331_vm8, %v2428_v57  ;;  %3775 = vmatmul.mubr.msk.f32.vlgmr.msra.gmra.mxu1 %vm819_vm7, %v2428_v57  ;;  %3781 = vmatprep.subr.mxu0 %v4379_v1  ;;  %v2653_v57 = vld [vmem:[#allocation4 + $0x3] sm:$0x1] }
0x111a   : > { %3796 = vmatprep.mubr.msk.f32.mxu1 %vm4381_vm0, %v4379_v1  ;;  %3789 = vmatpush3.msra.mxu1 %v2946_v49 }
0x111b   : > { %3790 = vmatprep.subr.mxu1 %v4379_v1 }
0x111c   : > { %3791 = vmatpush3.msra.mxu1 %v2945_v54 }
0x111d   : > { %3792 = vmatprep.subr.mxu1 %v4379_v1 }
0x111e   : > { %3793 = vmatpush3.msra.mxu1 %v2944_v61 }
0x111f   : > { %3794 = vmatprep.subr.mxu1 %v4379_v1 }
0x1120   : > { %3795 = vmatpush3.msra.mxu1 %v2943_v4 }
0x11d5   : > { %v2502_v2 = vpop.f32.mrf.mxu0 }
0x11d6   : > { %v2506_v60 = vadd.f32 %v2502_v2, %v2433_v59  ;;  %v2651_v59 = vld [vmem:[#allocation4 + $0x1] sm:$0x1]  ;;  %v2652_v2 = vld [vmem:[#allocation4 + $0x2] sm:$0x1] }
0x11d7   : > { %v3765_v3 = vpop.f32.mrf.mxu0 }
0x11d8   : > { %4021 = vtanh.f32 %v2506_v60  ;;  %v3493_v8 = vmul.f32 -1.442695, %v2506_v60  ;;  %v2676_v60 = vcombine.low %v2652_v2, %v2653_v57 }
0x11d9   : > { %v2577_v7 = vpop.f32.mrf.mxu1 }
0x11da   : > { %v2581_v15 = vadd.f32 %v2577_v7, %v2508_v62  ;;  %v2650_v62 = vld [vmem:[#allocation4] sm:$0x1]  ;;  %v2655_v7 = vld [vmem:[#allocation4 + $0x5] sm:$0x1] }
0x11db   : > { %v3776_v63 = vpop.f32.mrf.mxu1 }
0x11dc   : > { %4023 = vtanh.f32 %v2581_v15  ;;  %v3494_v10 = vmul.f32 -1.442695, %v2581_v15  ;;  %v2939_v15 = vld [vmem:[#allocation5 + $0x3] sm:$0x1]  ;;  %v2675_v63 = vcombine.low %v2650_v62, %v2651_v59 }
0x11dd   : > { %4025 = vpow2.f32 %v3493_v8 }
0x11de   : > { %4027 = vpow2.f32 %v3494_v10 }
0x11e5   : > { %v4022_v5 = vpop.eup %4021 }
0x11e6   : > { %2598 = vrot.lane.b32.xlu0 %v4022_v5, %s4384_s12  ;;  %v2654_v5 = vld [vmem:[#allocation4 + $0x4] sm:$0x1] }
0x11e7   : > { %v2677_v8 = vcombine.low %v2654_v5, %v2655_v7 }
0x11e9   : > { %v4024_v6 = vpop.eup %4023 }
0x11ea   : > { %2609 = vrot.lane.b32.xlu1 %v4024_v6, %s4384_s12  ;;  %v4026_v11 = vpop.eup %4025  ;;  %v2937_v6 = vld [vmem:[#allocation5 + $0x1] sm:$0x1] }
0x11eb   : > { %v2585_v16 = vadd.f32 1.0, %v4026_v11  ;;  %v4028_v17 = vpop.eup %4027 }
0x11ec   : > { %v2591_v18 = vadd.f32 1.0, %v4028_v17  ;;  %v2941_v17 = vld [vmem:[#allocation5 + $0x5] sm:$0x1] }
0x11ed   : > { %4029 = vrcp.f32 %v2585_v16  ;;  %v2936_v16 = vld [vmem:[#allocation5] sm:$0x1] }
0x11ee   : > { %4031 = vrcp.f32 %v2591_v18  ;;  %v2684_v18 = vrot.slane %v2675_v63, %v4909_v19 }
0x11fa   : > { %v4030_v12 = vpop.eup %4029 }
0x11fb   : > { %v4032_v21 = vpop.eup %4031  ;;  %v2596_v24 = vmul.f32 %v4030_v12, %v2388_v47  ;;  %v2658_v47 = vld [vmem:[#allocation14 + $0x8] sm:$0xff] }
0x11fc   : > { %v2607_v28 = vmul.f32 %v4032_v21, %v2399_v51  ;;  %3782 = vmatpush3.msra.mxu0 %v2658_v47 }
0x11fd   : > { %3783 = vmatprep.subr.mxu0 %v4379_v1  ;;  %v2691_v1 = vrot.slane %v2676_v60, %v4909_v19 }
0x11fe   : > { %3784 = vmatpush3.msra.mxu0 %v2657_v58 }
0x1258   : > { %v2599_v20 = vpop.permute.xlu0 %2598 }
0x1259   : > { %v2601_v13 = vmul.f32 %v4030_v12, %v2599_v20  ;;  %v2940_v20 = vld [vmem:[#allocation5 + $0x4] sm:$0x1] }
0x125b   : > { %2603 = vrot.lane.b32.xlu0 %v2601_v13, %s4384_s12  ;;  %v2698_v13 = vrot.slane %v2677_v8, %v4909_v19 }
0x125c   : > { %v2610_v22 = vpop.permute.xlu1 %2609 }
0x125d   : > { %v2612_v23 = vmul.f32 %v4032_v21, %v2610_v22  ;;  %v2963_v22 = vcombine.low %v2940_v20, %v2941_v17  ;;  %v3498_v17 = vld [vmem:[%s5333_s7] ss:$0 sm:$0xff] }
0x125e   : > { %v3503_v20 = vld [vmem:[%s5340_s14] ss:$0 sm:$0xff] }
0x125f   : > { %2614 = vrot.lane.b32.xlu1 %v2612_v23, %s4384_s12 }
0x12cd   : > { %v2604_v25 = vpop.permute.xlu0 %2603 }
0x12ce   : > { %v2606_v27 = vadd.f32 %v2604_v25, %v2596_v24 }
0x12d0   : > { %4033 = vtanh.f32 %v2606_v27 }
0x12d1   : > { %v2615_v29 = vpop.permute.xlu1 %2614 }
0x12d2   : > { %v2617_v41 = vadd.f32 %v2615_v29, %v2607_v28 }
0x12d4   : > { %4035 = vtanh.f32 %v2617_v41  ;;  %v2984_v41 = vrot.slane %v2963_v22, %v4909_v19 }
0x12dd   : > { %v4034_v42 = vpop.eup %4033 }
0x12de   : > { %2620 = vrot.lane.b32.xlu0 %v4034_v42, %s4384_s12 }
0x12e1   : > { %v4036_v43 = vpop.eup %4035 }
0x12e2   : > { %2626 = vrot.lane.b32.xlu1 %v4036_v43, %s4384_s12  ;;  %s3238_s12 = sshll.u32 %s691_s1, 4  ;;  %s5250_s12 = int_to_ptr.vmem [resolvable:$true] %s3238_s12 }
0x12e3   : > { %s4253_s23 = scalar_lea.vmem %s5250_s12, 128  ;;  %p4260_p6 = scmp.lt.s32.totalorder %s5250_s12, %s4258_s30 }
0x12e4   : > { %p4254_p5 = scmp.ne.s32.totalorder %s5250_s12, %s4253_s23  ;;  %p4261_p2 = scmp.lt.s32.totalorder %s4259_s20, %s4253_s23 }
0x12e6   : > { %p4262_p3 = por %p4261_p2, %p4260_p6 }
0x1350   : > { %v2621_v51 = vpop.permute.xlu0 %2620 }
0x1351   : > { %v2623_v50 = vmul.f32 %v4030_v12, %v2621_v51  ;;  %v2961_v12 = vcombine.low %v2936_v16, %v2937_v6  ;;  %v3495_v51 = vld [vmem:[%s5332_s6] ss:$0 sm:$0xff] }
0x1353   : > { %v2634_v52 = vrot.slane %v2623_v50, %v4937_v56  ;;  %v2970_v27 = vrot.slane %v2961_v12, %v4909_v19 }
0x1354   : > { %v2627_v0 = vpop.permute.xlu1 %2626 }
0x1355   : > { %v2629_v55 = vmul.f32 %v4032_v21, %v2627_v0  ;;  %2635 = vrot.lane.b32.xlu0 %v2634_v52, %s4385_s26  ;;  %v2706_v21 = vcombine.low %v2684_v18, %v2691_v1  ;;  %v3500_v0 = vld [vmem:[%s5339_s13] ss:$0 sm:$0xff] }
0x1357   : > { %v2644_v53 = vrot.slane %v2629_v55, %v4937_v56  ;;  %v2938_v56 = vld [vmem:[#allocation5 + $0x2] sm:$0x1]  ;;  %v2714_v28 = vrot.slane %v2706_v21, %v4909_v19 }
0x1358   : > { %v2962_v10 = vcombine.low %v2938_v56, %v2939_v15 }
0x1359   : > { %2645 = vrot.lane.b32.xlu1 %v2644_v53, %s4385_s26  ;;  %s5404_s26 = sld [smem:[#allocation35_spill]] }
0x135a   : > { %v2977_v23 = vrot.slane %v2962_v10, %v4909_v19 }
0x135c   : > { %v2992_v42 = vcombine.low %v2970_v27, %v2977_v23 }
0x135e   : > { %v3000_v49 = vrot.slane %v2992_v42, %v4909_v19 }
0x135f   : > { %p5406_p9 = scmp.ne.s32.totalorder %s5404_s26, 0 }
0x1361   : > { %p4255_p1 = pnand %p4254_p5, %p5406_p9 }
0x1363   : > { %p4256_p4 = pneg %p4255_p1 }
0x1365   : > { %p4263_p7 = pnand %p4262_p3, %p4256_p4 }
0x13c7   : > { %v2636_v3 = vpop.permute.xlu0 %2635 }
0x13c8   : > { %2639 = vst.msk [vmem:[#allocation4 + $0x6] sm:$0x1] %vm1331_vm8, %v2636_v3 }
0x13cb   : > { %v2646_v11 = vpop.permute.xlu1 %2645 }
0x13cc   : > { %2649 = vst.msk [vmem:[#allocation5 + $0x6] sm:$0x1] %vm1331_vm8, %v2646_v11 }
0x13cf   : > { %v3496_v24 = vld.sshfl [vmem:[#allocation4 + $0x6] sm:$0x1 pattern:$0x75316420] }
0x13d0   : > { %v2707_v25 = vcombine.low %v2698_v13, %v3496_v24  ;;  %v3499_v13 = vld [vmem:[%s5334_s8] ss:$0 sm:$0xff] }
0x13d2   : > { %v2721_v29 = vrot.slane %v2707_v25, %v4909_v19  ;;  %v3504_v25 = vld [vmem:[%s5403_s24] ss:$0 sm:$0xff] }
0x13d3   : > { %v3501_v43 = vld.sshfl [vmem:[#allocation5 + $0x6] sm:$0x1 pattern:$0x75316420] }
0x13d4   : > { %v2722_v44 = vcombine.low %v2714_v28, %v2721_v29  ;;  %v2993_v48 = vcombine.low %v2984_v41, %v3501_v43 }
0x13d6   : > { %3786 = vmatmul.mubr.msk.f32.vlgmr.msra.gmra.mxu0 %vm819_vm7, %v2722_v44  ;;  %v3007_v54 = vrot.slane %v2993_v48, %v4909_v19 }
0x13d8   : > { %v3008_v47 = vcombine.low %v3000_v49, %v3007_v54 }
0x13da   : > { %3797 = vmatmul.mubr.msk.f32.vlgmr.msra.gmra.mxu1 %vm819_vm7, %v3008_v47 }
0x1496   : > { %v2791_v58 = vpop.f32.mrf.mxu0 }
0x1497   : > { %v2792_v50 = vadd.f32 %v3495_v51, %v2791_v58 }
0x1498   : > { %v3787_v52 = vpop.f32.mrf.mxu0 }
0x1499   : > { %v2796_v55 = vsel %vm2795_vm9, %v2792_v50, 0.0 }
0x149a   : > { %v3077_v61 = vpop.f32.mrf.mxu1  ;;  %2797 = vadd.xlane.f32.xlu0 %v2796_v55 }
0x149b   : > { %v3078_v4 = vadd.f32 %v3500_v0, %v3077_v61 }
0x149c   : > { %v3798_v53 = vpop.f32.mrf.mxu1 }
0x149d   : > { %v3081_v57 = vsel %vm2795_vm9, %v3078_v4, 0.0 }
0x149e   : > { %3082 = vadd.xlane.f32.xlu1 %v3081_v57 }
0x1523   : > { %v2798_v59 = vpop.xlane.xlu0 %2797 }
0x1524   : > { %v2800_v2 = vmul.f32 0.03125, %v2798_v59 }
0x1526   : > { %v2801_v60 = vsub.f32 %v2792_v50, %v2800_v2 }
0x1527   : > { %v3083_v3 = vpop.xlane.xlu1 %3082 }
0x1528   : > { %v3084_v62 = vmul.f32 0.03125, %v3083_v3  ;;  %v2802_v7 = vmul.f32 %v2801_v60, %v2801_v60  ;;  %v2814_v18 = vmul.f32 %v3498_v17, %v2801_v60 }
0x152a   : > { %v3085_v15 = vsub.f32 %v3078_v4, %v3084_v62  ;;  %v2803_v63 = vsel %vm2795_vm9, %v2802_v7, 0.0 }
0x152b   : > { %2804 = vadd.xlane.f32.xlu0 %v2803_v63 }
0x152c   : > { %v3086_v5 = vmul.f32 %v3085_v15, %v3085_v15  ;;  %v3098_v22 = vmul.f32 %v3503_v20, %v3085_v15 }
0x152e   : > { %v3087_v6 = vsel %vm2795_vm9, %v3086_v5, 0.0 }
0x152f   : > { %3088 = vadd.xlane.f32.xlu0 %v3087_v6 }
0x15b4   : > { %v2805_v56 = vpop.xlane.xlu0 %2804 }
0x15b5   : > { %v2806_v8 = vmul.f32 0.03125, %v2805_v56 }
0x15b7   : > { %v2815_v1 = vadd.f32 1.1920929e-07, %v2806_v8 }
0x15b8   : > { %v3089_v10 = vpop.xlane.xlu0 %3088 }
0x15b9   : > { %4037 = vrsqrt.f32 %v2815_v1  ;;  %v3090_v11 = vmul.f32 0.03125, %v3089_v10 }
0x15bb   : > { %v3099_v16 = vadd.f32 1.1920929e-07, %v3090_v11 }
0x15bd   : > { %4039 = vrsqrt.f32 %v3099_v16 }
0x15c6   : > { %v4038_v12 = vpop.eup %4037 }
0x15c7   : > { %v2817_v21 = vmul.f32 %v4038_v12, %v2814_v18 }
0x15c9   : > { %v2825_v23 = vadd.f32 %v3499_v13, %v2817_v21 }
0x15ca   : > { %v4040_v24 = vpop.eup %4039 }
0x15cb   : > { %v2827_v27 = vcombine.high %v2825_v23, %v2825_v23  ;;  %v2834_v28 = vrot.slane %v2825_v23, %v4909_v19  ;;  %v3101_v29 = vmul.f32 %v4040_v24, %v3098_v22 }
0x15cd   : > { %v2841_v41 = vrot.slane %v2827_v27, %v4909_v19  ;;  %v2842_v42 = vcombine.high %v2834_v28, %v2834_v28  ;;  %v2850_v43 = vrot.slane %v2834_v28, %v4909_v19  ;;  %v3109_v44 = vadd.f32 %v3504_v25, %v3101_v29 }
0x15cf   : > { %v2857_v48 = vrot.slane %v2841_v41, %v4909_v19  ;;  %v2864_v49 = vrot.slane %v2842_v42, %v4909_v19  ;;  %v2872_v54 = vcombine.high %v2850_v43, %v2850_v43  ;;  %v3111_v47 = vcombine.high %v3109_v44, %v3109_v44 }
0x15d0   : > { %v3118_v51 = vrot.slane %v3109_v44, %v4909_v19  ;;  %v2843_v58 = vcombine.high %v2841_v41, %v2841_v41  ;;  %v2882_v50 = vadd.f32 %v2850_v43, %v4766_v26 }
0x15d1   : > { %v3125_v52 = vrot.slane %v3111_v47, %v4909_v19  ;;  %v2873_v0 = vcombine.high %v2857_v48, %v2857_v48  ;;  %v2874_v55 = vcombine.high %v2864_v49, %v2864_v49  ;;  %v2883_v61 = vadd.f32 %v2864_v49, %v4783_v33 }
0x15d2   : > { %v3126_v4 = vcombine.high %v3118_v51, %v3118_v51  ;;  %v3134_v53 = vrot.slane %v3118_v51, %v4909_v19  ;;  %v2871_v57 = vrot.slane %v2843_v58, %v4909_v19  ;;  %v2884_v59 = vadd.f32 %v2872_v54, %v4776_v31 }
0x15d3   : > { %v3141_v2 = vrot.slane %v3125_v52, %v4909_v19  ;;  %v2885_v60 = vadd.f32 %v2874_v55, %v4803_v39  ;;  %v2886_v3 = vadd.f32 %v2857_v48, %v4779_v32  ;;  %v2887_v26 = vadd.f32 %v2873_v0, %v4786_v34 }
0x15d4   : > { %v3148_v62 = vrot.slane %v3126_v4, %v4909_v19  ;;  %v3156_v7 = vcombine.high %v3134_v53, %v3134_v53  ;;  %v2888_v15 = vcombine.low %v2882_v50, %v2884_v59  ;;  %v3127_v5 = vcombine.high %v3125_v52, %v3125_v52 }
0x15d5   : > { %v2896_v33 = vcombine.low %v2883_v61, %v2885_v60  ;;  %v2904_v63 = vcombine.low %v2886_v3, %v2887_v26  ;;  %v3157_v6 = vcombine.high %v3141_v2, %v3141_v2  ;;  %v2912_v31 = vadd.f32 %v2871_v57, %v4807_v40 }
0x15d6   : > { %v2895_v56 = vrot.slane %v2888_v15, %v4746_v9  ;;  %v3158_v8 = vcombine.high %v3148_v62, %v3148_v62  ;;  %v3166_v1 = vadd.f32 %v3134_v53, %v4773_v30  ;;  %v3167_v34 = vadd.f32 %v3148_v62, %v4796_v37 }
0x15d7   : > { %v2903_v39 = vrot.slane %v2896_v33, %v4746_v9  ;;  %v2911_v32 = vrot.slane %v2904_v63, %v4746_v9  ;;  %v3168_v10 = vadd.f32 %v3156_v7, %v4789_v35  ;;  %v3155_v11 = vrot.slane %v3127_v5, %v4909_v19 }
0x15d8   : > { %v3169_v16 = vadd.f32 %v3158_v8, %v4817_v45  ;;  %v3170_v17 = vadd.f32 %v3141_v2, %v4792_v36  ;;  %v3171_v40 = vadd.f32 %v3157_v6, %v4799_v38 }
0x15d9   : > { %v2913_v18 = vcombine.low %v2895_v56, %v2903_v39  ;;  %v2921_v30 = vcombine.low %v2911_v32, %v2912_v31  ;;  %v3172_v12 = vcombine.low %v3166_v1, %v3168_v10  ;;  %v3196_v36 = vadd.f32 %v3155_v11, %v4821_v46 }
0x15da   : > { %v3180_v20 = vcombine.low %v3167_v34, %v3169_v16  ;;  %v3188_v13 = vcombine.low %v3170_v17, %v3171_v40 }
0x15db   : > { %v2920_v37 = vrot.slane %v2913_v18, %v4749_v14  ;;  %v2928_v35 = vrot.slane %v2921_v30, %v4749_v14  ;;  %v3179_v19 = vrot.slane %v3172_v12, %v4746_v9 }
0x15dc   : > { %v3187_v21 = vrot.slane %v3180_v20, %v4746_v9  ;;  %v3195_v45 = vrot.slane %v3188_v13, %v4746_v9 }
0x15dd   : > { %v2929_v38 = vcombine.low %v2920_v37, %v2928_v35 }
0x15de   : > { %v3197_v22 = vcombine.low %v3179_v19, %v3187_v21  ;;  %v3205_v23 = vcombine.low %v3195_v45, %v3196_v36 }
0x15df   : > { %v2931_v24 = vrot.slane %v2929_v38, 7 }
0x15e0   : > { %v3204_v9 = vrot.slane %v3197_v22, %v4749_v14  ;;  %v3212_v46 = vrot.slane %v3205_v23, %v4749_v14 }
0x15e1   : > { %v2934_v25 = vsel %vm2933_vm10, 0.0, %v2931_v24 }
0x15e2   : > { %2935 = vst.msk [vmem:[%s691_s1] sm:$0xff] %vm819_vm7, %v2934_v25  ;;  %v3213_v27 = vcombine.low %v3204_v9, %v3212_v46 }
0x15e3   : > { %4266 = shalt.err (!%p4263_p7)
}
0x15e4   : > { %s4267_s28 = scalar_lea.hbm %s5248_s9, 128  ;;  %s4271_s17 = scalar_lea.hbm %s5405_s5, 256 }
0x15e5   : > { %p4268_p12 = scmp.ne.s32.totalorder %s5248_s9, %s4267_s28  ;;  %p4272_p10 = scmp.lt.s32.totalorder %s5248_s9, %s5405_s5 }
0x15e6   : > { %p4273_p11 = scmp.lt.s32.totalorder %s4271_s17, %s4267_s28 }
0x15e7   : > { %p4269_p0 = pnand %p4268_p12, %p5406_p9 }
0x15e8   : > { %p4274_p13 = por %p4273_p11, %p4272_p10 }
0x15e9   : > { %p4270_p8 = pneg %p4269_p0 }
0x15eb   : > { %p4275_p5 = pnand %p4274_p13, %p4270_p8 }
0x15ed   : > { %4278 = shalt.err (!%p4275_p5)
}
0x15ee   : > { %3827 = dma.vmem_to_hbm [thread:$0]  (%p5406_p9), %s5250_s12, 128, %s5248_s9, %s3220_s15   ;;  %v3215_v14 = vrot.slane %v3213_v27, 7 }
0x15ef   : > { %s5407_s20 = sld [smem:[#allocation47_spill]]  ;;  %s3225_s28 = scalar_lea.sflag [#allocation22], %s4704_s19 }
0x15f0   : > { %v3217_v28 = vsel %vm2933_vm10, 0.0, %v3215_v14  ;;  %s4279_s1 = scalar_lea.vmem %s3252_s16, 128  ;;  %s4387_s12 = smov [#allocation21]  }
0x15f1   : > { %3218 = vst.msk [vmem:[%s698_s21] sm:$0xff] %vm819_vm7, %v3217_v28  ;;  %p4280_p1 = scmp.ne.s32.totalorder %s3252_s16, %s4279_s1  ;;  %s4283_s9 = sshll.u32 %s4387_s12, 4  ;;  %s4284_s9 = int_to_ptr.vmem [resolvable:$false] %s4283_s9 }
0x15f2   : > { %s4285_s0 = scalar_lea.vmem %s4284_s9, 256  ;;  %p4286_p2 = scmp.lt.s32.totalorder %s3252_s16, %s4284_s9 }
0x15f3   : > { %p4281_p4 = pnand %p4280_p1, %p5406_p9  ;;  %p4287_p3 = scmp.lt.s32.totalorder %s4285_s0, %s4279_s1 }
0x15f5   : > { %s5285_s24 = scalar_lea.hbm %s5407_s20, %s3507_s29  ;;  %p4282_p6 = pneg %p4281_p4 }
0x15f6   : > { %p4288_p7 = por %p4287_p3, %p4286_p2 }
0x15f8   : > { %p4289_p12 = pnand %p4288_p7, %p4282_p6 }
0x15fa   : > { %4292 = shalt.err (!%p4289_p12)
}
0x15fb   : > { %s4293_s2 = scalar_lea.hbm %s5285_s24, 128  ;;  %s4297_s21 = scalar_lea.hbm %s5407_s20, 256 }
0x15fc   : > { %p4294_p0 = scmp.ne.s32.totalorder %s5285_s24, %s4293_s2  ;;  %p4298_p11 = scmp.lt.s32.totalorder %s5285_s24, %s5407_s20 }
0x15fd   : > { %p4299_p13 = scmp.lt.s32.totalorder %s4297_s21, %s4293_s2 }
0x15fe   : > { %p4295_p8 = pnand %p4294_p0, %p5406_p9 }
0x15ff   : > { %p4300_p5 = por %p4299_p13, %p4298_p11 }
0x1600   : > { %p4296_p10 = pneg %p4295_p8 }
0x1602   : > { %p4301_p1 = pnand %p4300_p5, %p4296_p10 }
0x1604   : > { %4304 = shalt.err (!%p4301_p1)
}
0x1605   : > { %3828 = dma.vmem_to_hbm [thread:$0]  (%p5406_p9), %s3252_s16, 128, %s5285_s24, %s3225_s28  }
0x1606 PF: > { %s5408_s18 = sld [smem:[#allocation31_spill]]  ;;  %p5411_p6 = scmp.ge.s32.totalorder %s4367_s27, 2 }
0x1607   : > { %s5409_s10 = sld [smem:[#allocation36_spill]] }
0x160c   : > { %s3263_s23 = sand.u32 1, %s5408_s18  }
0x160d   : > { %p5410_p4 = scmp.ne.s32.totalorder %s5409_s10, 0  ;;  %s3264_s30 = scalar_lea.sflag [#allocation8], %s3263_s23 }
0x160f   : > { %p3858_p2 = pnand %p5411_p6, %p5410_p4 }
0x1611   : > { %p3859_p3 = pneg %p3858_p2 }
0x1613   : > { %4346 = dma.done.wait (%p3859_p3), %s3264_s30, 128  }
0x1614   : > { %4348 = vsyncadd (%p3859_p3), %s3264_s30, 4294967168  ;;  %s3273_s1 = scalar_lea.sflag [#allocation22], %s3263_s23 }
0x1615   : > { %4350 = dma.done.wait (%p3859_p3), %s3273_s1, 128  }
0x1616   : > { %4352 = vsyncadd (%p3859_p3), %s3273_s1, 4294967168  ;;  %s5412_s27 = sld [smem:[#allocation33_spill]]  ;;  %s5415_s24 = smov %s4359_s25 }
0x1617   : > { %s5413_s26 = sld [smem:[#allocation32_spill]] }
0x1618   : > { %s5414_s12 = sld [smem:[#allocation34_spill]] }
0x161c   : > { %p40_p9 = scmp.ge.s32.totalorder %s5412_s27, 4  }
0x161d   : > { %s5416_s25 = smov %s5413_s26 }
0x161e   : > { %s5417_s26 = smov %s5414_s12  ;;  %42 = sbr.rel (!%p40_p9) target bundleno = 24 (0x18), region = 207 }
0x1623   :  { %3278 = vsyncpa [#allocation7], 1 }
0x1624   :  { %3280 = vsyncpa [#allocation7 + $0x1], 1 }
0x1625   :  { %3281 = vsyncpa [#allocation10], 1 }
0x1626   :  { %3283 = vsyncpa [#allocation10 + $0x1], 1 }
0x1627   :  { %3284 = vsyncpa [#allocation13], 1 }
0x1628   :  { %3285 = vsyncpa [#allocation16], 1 }
0x1629   :  { %3286 = vsyncpa [#allocation19], 1 }
0x162a   :  { %3287 = vsyncpa [#allocation8], 1 }
0x162b   :  { %3289 = vsyncpa [#allocation8 + $0x1], 1 }
0x162c   :  { %3290 = vsyncpa [#allocation22], 1 }
0x162d   :  { %3292 = vsyncpa [#allocation22 + $0x1], 1 }

</bundles_post_ra>
